<compile_context>
chip_gen: v7x
topology: tpu7x:2x2x1
jax: 0.10.0
libtpu: 0.0.40
codegen_flags: <defaults>
</compile_context>

<pallas_src>
import functools
import math

import jax
import jax.numpy as jnp
from jax.experimental import pallas as pl
from jax.experimental.pallas import tpu as pltpu


# --------------------------------------------------------------------------
# small helpers
# --------------------------------------------------------------------------
def _round_up(a: int, m: int) -> int:
    return ((a + m - 1) // m) * m


@functools.lru_cache(maxsize=None)
def _default_q_tile() -> int:
    """128 on v5e (128-wide MXU), 256 on v6e/v7x (256-wide MXU)."""
    try:
        kind = jax.devices()[0].device_kind.lower()
    except Exception:
        kind = ""
    if "v5 lite" in kind or "v5e" in kind:
        return 128
    return 256


@functools.lru_cache(maxsize=None)
def _vmem_limit_bytes() -> int:
    """Per-generation VMEM budget (physical capacity minus headroom)."""
    try:
        cap = int(pltpu.get_tpu_info().vmem_capacity_bytes)
    except Exception:
        cap = 64 * 1024 * 1024          # conservative (v7x per-TensorCore)
    cap = min(cap, 128 * 1024 * 1024)
    return max(cap - (16 << 20), 32 << 20)   # leave room for compiler scratch


@functools.lru_cache(maxsize=None)
def _single_buffer_ok() -> bool:
    """Probe whether pipeline_mode=pl.Buffered(1) is supported (cheap compile)."""
    def _copy(i_ref, o_ref):
        o_ref[...] = i_ref[...]
    try:
        fn = pl.pallas_call(
            _copy,
            out_shape=jax.ShapeDtypeStruct((8, 128), jnp.float32),
            grid=(1,),
            in_specs=[pl.BlockSpec((8, 128), lambda i: (0, 0),
                                   pipeline_mode=pl.Buffered(1))],
            out_specs=pl.BlockSpec((8, 128), lambda i: (0, 0)),
        )
        jax.block_until_ready(fn(jnp.zeros((8, 128), jnp.float32)))
        return True
    except Exception:
        return False


# --------------------------------------------------------------------------
# kernel
# --------------------------------------------------------------------------
def _encoder_layer_kernel(x_ref, y_ref,
                          wq_ref, bq_ref, wkv_ref, bkv_ref,
                          wo_ref, bo_ref,
                          g1_ref, be1_ref,
                          w1_ref, bf1_ref, w2_ref, bf2_ref,
                          g2_ref, be2_ref,
                          o_ref,
                          *, num_heads: int, head_dim: int):
    eps = 1e-5
    H, Dh = num_heads, head_dim

    x32 = x_ref[0].astype(jnp.float32)         # (TQ, D) residual path, f32
    xb = x32.astype(jnp.bfloat16)
    yb = y_ref[0]                              # (S, D) already bf16
    TQ, D = x32.shape

    # --- fused, full-width projections (single wide MXU matmuls) -----------
    # 1/sqrt(Dh) is folded into wq / bq in the wrapper.
    q = (jnp.dot(xb, wq_ref[...], preferred_element_type=jnp.float32)
         + bq_ref[...]).astype(jnp.bfloat16)                     # (TQ, D)
    kv = (jnp.dot(yb, wkv_ref[...], preferred_element_type=jnp.float32)
          + bkv_ref[...]).astype(jnp.bfloat16)                   # (S, 2D)=[K|V]

    # --- per-head attention with accumulated output projection -------------
    # Static lane slices + 2-D MXU matmuls; the output projection accumulates
    # (TQ,Dh)@(Dh,D) per head — same FLOPs as concat + (TQ,D)@(D,D), no concat
    # copies, no broadcasts, and only one (TQ,S) score tile live at a time.
    attn = jnp.zeros((TQ, D), jnp.float32)
    for h in range(H):
        q_h = q[:, h * Dh:(h + 1) * Dh]                          # (TQ, Dh)
        k_h = kv[:, h * Dh:(h + 1) * Dh]                         # (S,  Dh)
        v_h = kv[:, D + h * Dh: D + (h + 1) * Dh]                # (S,  Dh)

        # NT matmul: contract the last dim of both operands (no K transpose).
        s = jax.lax.dot_general(q_h, k_h, (((1,), (1,)), ((), ())),
                                preferred_element_type=jnp.float32)  # (TQ, S)
        s = s - jnp.max(s, axis=-1, keepdims=True)
        p = jnp.exp(s)
        p = p * pl.reciprocal(jnp.sum(p, axis=-1, keepdims=True), approx=True)

        o_h = jnp.dot(p.astype(jnp.bfloat16), v_h,
                      preferred_element_type=jnp.float32)         # (TQ, Dh)
        attn += jnp.dot(o_h.astype(jnp.bfloat16),
                        wo_ref[h * Dh:(h + 1) * Dh, :],
                        preferred_element_type=jnp.float32)       # (TQ, D)
    attn = attn + bo_ref[...]

    # --- residual + LayerNorm 1 (f32 statistics) ---------------------------
    h1 = x32 + attn
    mu = jnp.mean(h1, axis=-1, keepdims=True)
    var = jnp.mean((h1 - mu) ** 2, axis=-1, keepdims=True)
    h1 = (h1 - mu) * jax.lax.rsqrt(var + eps) * g1_ref[...] + be1_ref[...]

    # --- feed-forward (ReLU), bf16 MXU with f32 accumulation ---------------
    f = jnp.dot(h1.astype(jnp.bfloat16), w1_ref[...],
                preferred_element_type=jnp.float32) + bf1_ref[...]
    f = jnp.maximum(f, 0.0)
    f = jnp.dot(f.astype(jnp.bfloat16), w2_ref[...],
                preferred_element_type=jnp.float32) + bf2_ref[...]

    # --- residual + LayerNorm 2 ---------------------------------------------
    h2 = h1 + f
    mu = jnp.mean(h2, axis=-1, keepdims=True)
    var = jnp.mean((h2 - mu) ** 2, axis=-1, keepdims=True)
    h2 = (h2 - mu) * jax.lax.rsqrt(var + eps) * g2_ref[...] + be2_ref[...]

    o_ref[0] = h2.astype(o_ref.dtype)


# --------------------------------------------------------------------------
# wrapper
# --------------------------------------------------------------------------
def encoder_layer_pallas(x, y, params, *, num_heads, q_tile=None):
    """One cross-attention encoder layer: z = layer(x, y). Shapes (B, S, D)."""
    B, S, D = x.shape
    Sk = y.shape[1]
    F = params["w1"].shape[-1]
    H = num_heads
    assert D % H == 0, "d_model must be divisible by num_heads"
    Dh = D // H

    if q_tile is None:
        q_tile = _default_q_tile()

    # Query tiling: pad S up to a multiple of the tile (keeps tiles bounded and
    # sublane-aligned even for non-divisible S); output is trimmed afterwards.
    TQ = min(q_tile, _round_up(S, 8))
    S_pad = _round_up(S, TQ)
    n_q = S_pad // TQ
    x_in = jnp.pad(x, ((0, 0), (0, S_pad - S), (0, 0))) if S_pad != S else x

    bf16, f32 = jnp.bfloat16, jnp.float32
    scale = 1.0 / math.sqrt(Dh)

    # One-time weight transforms (plain JAX, outside the kernel):
    #   * fold the 1/sqrt(Dh) softmax scale into Wq / bq,
    #   * fuse Wk|Wv into a single (D, 2D) weight (one wide matmul over y).
    wq = (params["wq"] * scale).astype(bf16)
    bq = (params["bq"] * scale).astype(f32)
    wkv = jnp.concatenate([params["wk"], params["wv"]], axis=1).astype(bf16)
    bkv = jnp.concatenate([params["bk"], params["bv"]], axis=1).astype(f32)
    wo = params["wo"].astype(bf16)
    bo = params["bo"].astype(f32)
    w1, bf1 = params["w1"].astype(bf16), params["bf1"].astype(f32)
    w2, bf2 = params["w2"].astype(bf16), params["bf2"].astype(f32)
    g1, be1 = params["g1"].astype(f32), params["be1"].astype(f32)
    g2, be2 = params["g2"].astype(f32), params["be2"].astype(f32)

    # y is only ever consumed as bf16 inside the kernel: cast once here
    # (halves its HBM->VMEM DMA bytes and resident VMEM footprint).
    y_in = y.astype(bf16)

    # Weight/bias block indices never change across the grid -> single-buffer
    # them when supported (saves the 2x double-buffer VMEM copy, v7x-relevant).
    wmode = {"pipeline_mode": pl.Buffered(1)} if _single_buffer_ok() else {}

    def wspec(shape):
        nd = len(shape)
        return pl.BlockSpec(shape, lambda b, qi: (0,) * nd, **wmode)

    x_spec = pl.BlockSpec((1, TQ, D), lambda b, qi: (b, qi, 0))
    y_spec = pl.BlockSpec((1, Sk, D), lambda b, qi: (b, 0, 0))
    o_spec = pl.BlockSpec((1, TQ, D), lambda b, qi: (b, qi, 0))

    kernel = functools.partial(_encoder_layer_kernel, num_heads=H, head_dim=Dh)

    # Note (v7x): with 2 TensorCores per chip, keep B * n_q even when possible
    # so the last grid step does not leave one core idle.
    out = pl.pallas_call(
        kernel,
        out_shape=jax.ShapeDtypeStruct((B, S_pad, D), x.dtype),
        grid=(B, n_q),
        in_specs=[
            x_spec,                              # x (query tile, f32)
            y_spec,                              # y (K/V source, bf16, resident)
            wspec((D, D)),  wspec((1, D)),       # Wq (scale folded) / bq
            wspec((D, 2 * D)), wspec((1, 2 * D)),  # Wkv fused / bkv
            wspec((D, D)),  wspec((1, D)),       # Wo / bo
            wspec((1, D)),  wspec((1, D)),       # ln1 gamma / beta
            wspec((D, F)),  wspec((1, F)),       # W1 / b1
            wspec((F, D)),  wspec((1, D)),       # W2 / b2
            wspec((1, D)),  wspec((1, D)),       # ln2 gamma / beta
        ],
        out_specs=o_spec,
        compiler_params=pltpu.CompilerParams(
            dimension_semantics=("parallel", "parallel"),
            vmem_limit_bytes=_vmem_limit_bytes(),
        ),
    )(x_in, y_in,
      wq, bq, wkv, bkv, wo, bo,
      g1, be1, w1, bf1, w2, bf2, g2, be2)

    return out[:, :S, :] if S_pad != S else out


def encoder_forward(x, y, params, *, num_layers, num_heads):
    # Faithful to the PyTorch forward: the SAME layer is applied to the
    # UNCHANGED (x, y) every iteration and only the last z is returned — all
    # iterations are identical, so z is computed exactly once.
    del num_layers
    return encoder_layer_pallas(x, y, params, num_heads=num_heads)


# --------------------------------------------------------------------------
# parameters, reference, demo
# --------------------------------------------------------------------------
def make_params(key, d_model, d_ff):
    ks = jax.random.split(key, 8)
    init = lambda k, shape, s=0.05: (s * jax.random.normal(k, shape)).astype(jnp.float32)
    D, F = d_model, d_ff
    return {
        "wq": init(ks[0], (D, D)), "bq": jnp.zeros((1, D), jnp.float32),
        "wk": init(ks[1], (D, D)), "bk": jnp.zeros((1, D), jnp.float32),
        "wv": init(ks[2], (D, D)), "bv": jnp.zeros((1, D), jnp.float32),
        "wo": init(ks[3], (D, D)), "bo": jnp.zeros((1, D), jnp.float32),
        "g1": jnp.ones((1, D), jnp.float32), "be1": jnp.zeros((1, D), jnp.float32),
        "w1": init(ks[4], (D, F)), "bf1": jnp.zeros((1, F), jnp.float32),
        "w2": init(ks[5], (F, D)), "bf2": jnp.zeros((1, D), jnp.float32),
        "g2": jnp.ones((1, D), jnp.float32), "be2": jnp.zeros((1, D), jnp.float32),
    }


def _reference(x, y, params, *, num_heads):
    """Pure-JAX f32 reference of the encoder layer (for a loose sanity check)."""
    B, S, D = x.shape
    Sk = y.shape[1]
    H = num_heads
    Dh = D // H
    q = x @ params["wq"] + params["bq"]
    k = y @ params["wk"] + params["bk"]
    v = y @ params["wv"] + params["bv"]
    qh = q.reshape(B, S, H, Dh).transpose(0, 2, 1, 3)
    kh = k.reshape(B, Sk, H, Dh).transpose(0, 2, 1, 3)
    vh = v.reshape(B, Sk, H, Dh).transpose(0, 2, 1, 3)
    s = jnp.einsum('bhqe,bhke->bhqk', qh, kh) / math.sqrt(Dh)
    p = jax.nn.softmax(s, axis=-1)
    o = jnp.einsum('bhqk,bhke->bhqe', p, vh).transpose(0, 2, 1, 3).reshape(B, S, D)
    attn = o @ params["wo"] + params["bo"]

    def ln(a, g, b):
        mu = a.mean(-1, keepdims=True)
        var = ((a - mu) ** 2).mean(-1, keepdims=True)
        return (a - mu) / jnp.sqrt(var + 1e-5) * g + b

    h1 = ln(x + attn, params["g1"], params["be1"])
    f = jnp.maximum(h1 @ params["w1"] + params["bf1"], 0.0) @ params["w2"] + params["bf2"]
    return ln(h1 + f, params["g2"], params["be2"])


if __name__ == "__main__":
    B, S, D, H, F = 2, 8, 32, 4, 64
    num_layers = 2

    key = jax.random.PRNGKey(0)
    kx, ky, kp = jax.random.split(key, 3)
    x = jax.random.normal(kx, (B, S, D), jnp.float32)
    y = jax.random.normal(ky, (B, S, D), jnp.float32)
    params = make_params(kp, D, F)

    z = encoder_forward(x, y, params, num_layers=num_layers, num_heads=H)
    jax.block_until_ready(z)
    assert z.shape == (B, S, D)

    # Loose tolerance: bf16 MXU inputs and approx-reciprocal softmax.
    z_ref = _reference(x, y, params, num_heads=H)
    err = float(jnp.max(jnp.abs(z - z_ref)))
    assert err < 0.1, f"max abs error vs f32 reference: {err}"

    print("KERNEL_OK")
</pallas_src>

<mosaic_0001>
module attributes {stable_mosaic.version = 11 : i64} {
  func.func @_copy(%arg0: i32, %arg1: memref<8x128xf32, #tpu.memory_space<vmem>>, %arg2: memref<8x128xf32, #tpu.memory_space<vmem>>) attributes {dimension_semantics = [#tpu.dimension_semantics<arbitrary>], iteration_bounds = array<i64: 1>, scalar_prefetch = 0 : i64, scratch_operands = 0 : i64, tpu.core_type = #tpu.core_type<tc>, window_params = [{pipeline_mode = #tpu.pipeline_mode<synchronous>, transform_indices = @transform_0, window_bounds = array<i64: 8, 128>}, {pipeline_mode = #tpu.pipeline_mode<synchronous>, transform_indices = @transform_1, window_bounds = array<i64: 8, 128>}]} {
    %c0 = arith.constant 0 : index
    %c0_0 = arith.constant 0 : index
    %0 = vector.load %arg1[%c0, %c0_0] : memref<8x128xf32, #tpu.memory_space<vmem>>, vector<8x128xf32>
    %c0_1 = arith.constant 0 : index
    %c0_2 = arith.constant 0 : index
    %1 = vector.load %arg2[%c0_1, %c0_2] : memref<8x128xf32, #tpu.memory_space<vmem>>, vector<8x128xf32>
    tpu.vector_store %arg2[%c0_1, %c0_2], %0 {strides = array<i32>} : memref<8x128xf32, #tpu.memory_space<vmem>>, vector<8x128xf32>,
    return
  }
  func.func @transform_0(%arg0: i32) -> (i32, i32) {
    %c0_i32 = arith.constant 0 : i32
    %c0_i32_0 = arith.constant 0 : i32
    %c0_i32_1 = arith.constant 0 : i32
    return %c0_i32, %c0_i32_0 : i32, i32
  }
  func.func @transform_1(%arg0: i32) -> (i32, i32) {
    %c0_i32 = arith.constant 0 : i32
    %c0_i32_0 = arith.constant 0 : i32
    %c0_i32_1 = arith.constant 0 : i32
    return %c0_i32, %c0_i32_0 : i32, i32
  }
}

module attributes {stable_mosaic.version = 11 : i64} {
  func.func @_encoder_layer_kernel(%arg0: i32, %arg1: i32, %arg2: memref<1x8x32xf32, #tpu.memory_space<vmem>>, %arg3: memref<1x8x32xbf16, #tpu.memory_space<vmem>>, %arg4: memref<32x32xbf16, #tpu.memory_space<vmem>>, %arg5: memref<1x32xf32, #tpu.memory_space<vmem>>, %arg6: memref<32x64xbf16, #tpu.memory_space<vmem>>, %arg7: memref<1x64xf32, #tpu.memory_space<vmem>>, %arg8: memref<32x32xbf16, #tpu.memory_space<vmem>>, %arg9: memref<1x32xf32, #tpu.memory_space<vmem>>, %arg10: memref<1x32xf32, #tpu.memory_space<vmem>>, %arg11: memref<1x32xf32, #tpu.memory_space<vmem>>, %arg12: memref<32x64xbf16, #tpu.memory_space<vmem>>, %arg13: memref<1x64xf32, #tpu.memory_space<vmem>>, %arg14: memref<64x32xbf16, #tpu.memory_space<vmem>>, %arg15: memref<1x32xf32, #tpu.memory_space<vmem>>, %arg16: memref<1x32xf32, #tpu.memory_space<vmem>>, %arg17: memref<1x32xf32, #tpu.memory_space<vmem>>, %arg18: memref<1x8x32xf32, #tpu.memory_space<vmem>>) attributes {dimension_semantics = [#tpu.dimension_semantics<parallel>, #tpu.dimension_semantics<parallel>], iteration_bounds = array<i64: 2, 1>, scalar_prefetch = 0 : i64, scratch_operands = 0 : i64, tpu.core_type = #tpu.core_type<tc>, window_params = [{transform_indices = @transform_0, window_bounds = array<i64: 1, 8, 32>}, {transform_indices = @transform_1, window_bounds = array<i64: 1, 8, 32>}, {pipeline_mode = #tpu.pipeline_mode<synchronous>, transform_indices = @transform_2, window_bounds = array<i64: 32, 32>}, {pipeline_mode = #tpu.pipeline_mode<synchronous>, transform_indices = @transform_3, window_bounds = array<i64: 1, 32>}, {pipeline_mode = #tpu.pipeline_mode<synchronous>, transform_indices = @transform_4, window_bounds = array<i64: 32, 64>}, {pipeline_mode = #tpu.pipeline_mode<synchronous>, transform_indices = @transform_5, window_bounds = array<i64: 1, 64>}, {pipeline_mode = #tpu.pipeline_mode<synchronous>, transform_indices = @transform_6, window_bounds = array<i64: 32, 32>}, {pipeline_mode = #tpu.pipeline_mode<synchronous>, transform_indices = @transform_7, window_bounds = array<i64: 1, 32>}, {pipeline_mode = #tpu.pipeline_mode<synchronous>, transform_indices = @transform_8, window_bounds = array<i64: 1, 32>}, {pipeline_mode = #tpu.pipeline_mode<synchronous>, transform_indices = @transform_9, window_bounds = array<i64: 1, 32>}, {pipeline_mode = #tpu.pipeline_mode<synchronous>, transform_indices = @transform_10, window_bounds = array<i64: 32, 64>}, {pipeline_mode = #tpu.pipeline_mode<synchronous>, transform_indices = @transform_11, window_bounds = array<i64: 1, 64>}, {pipeline_mode = #tpu.pipeline_mode<synchronous>, transform_indices = @transform_12, window_bounds = array<i64: 64, 32>}, {pipeline_mode = #tpu.pipeline_mode<synchronous>, transform_indices = @transform_13, window_bounds = array<i64: 1, 32>}, {pipeline_mode = #tpu.pipeline_mode<synchronous>, transform_indices = @transform_14, window_bounds = array<i64: 1, 32>}, {pipeline_mode = #tpu.pipeline_mode<synchronous>, transform_indices = @transform_15, window_bounds = array<i64: 1, 32>}, {transform_indices = @transform_16, window_bounds = array<i64: 1, 8, 32>}]} {
    %c0 = arith.constant 0 : index
    %c0_0 = arith.constant 0 : index
    %c0_1 = arith.constant 0 : index
    %0 = vector.load %arg2[%c0, %c0_0, %c0_1] : memref<1x8x32xf32, #tpu.memory_space<vmem>>, vector<1x8x32xf32>
    %1 = vector.shape_cast %0 : vector<1x8x32xf32> to vector<8x32xf32>
    %2 = arith.truncf %1 : vector<8x32xf32> to vector<8x32xbf16>
    %c0_2 = arith.constant 0 : index
    %c0_3 = arith.constant 0 : index
    %c0_4 = arith.constant 0 : index
    %3 = vector.load %arg3[%c0_2, %c0_3, %c0_4] : memref<1x8x32xbf16, #tpu.memory_space<vmem>>, vector<1x8x32xbf16>
    %4 = vector.shape_cast %3 : vector<1x8x32xbf16> to vector<8x32xbf16>
    %c0_5 = arith.constant 0 : index
    %c0_6 = arith.constant 0 : index
    %5 = vector.load %arg4[%c0_5, %c0_6] : memref<32x32xbf16, #tpu.memory_space<vmem>>, vector<32x32xbf16>
    %cst = arith.constant dense<0.000000e+00> : vector<8x32xf32>
    %6 = tpu.matmul %2, %5, %cst {dimension_numbers = #tpu.dot_dimension_numbers<[1], [0], [0], [1], [0, 0, 1, 1], [], []>} : vector<8x32xbf16>, vector<32x32xbf16>, vector<8x32xf32> -> vector<8x32xf32>
    %c0_7 = arith.constant 0 : index
    %c0_8 = arith.constant 0 : index
    %7 = vector.load %arg5[%c0_7, %c0_8] : memref<1x32xf32, #tpu.memory_space<vmem>>, vector<1x32xf32>
    %8 = vector.broadcast %7 : vector<1x32xf32> to vector<8x32xf32>
    %9 = arith.addf %6, %8 : vector<8x32xf32>
    %10 = arith.truncf %9 : vector<8x32xf32> to vector<8x32xbf16>
    %c0_9 = arith.constant 0 : index
    %c0_10 = arith.constant 0 : index
    %11 = vector.load %arg6[%c0_9, %c0_10] : memref<32x64xbf16, #tpu.memory_space<vmem>>, vector<32x64xbf16>
    %cst_11 = arith.constant dense<0.000000e+00> : vector<8x64xf32>
    %12 = tpu.matmul %4, %11, %cst_11 {dimension_numbers = #tpu.dot_dimension_numbers<[1], [0], [0], [1], [0, 0, 1, 1], [], []>} : vector<8x32xbf16>, vector<32x64xbf16>, vector<8x64xf32> -> vector<8x64xf32>
    %c0_12 = arith.constant 0 : index
    %c0_13 = arith.constant 0 : index
    %13 = vector.load %arg7[%c0_12, %c0_13] : memref<1x64xf32, #tpu.memory_space<vmem>>, vector<1x64xf32>
    %14 = vector.broadcast %13 : vector<1x64xf32> to vector<8x64xf32>
    %15 = arith.addf %12, %14 : vector<8x64xf32>
    %16 = arith.truncf %15 : vector<8x64xf32> to vector<8x64xbf16>
    %cst_14 = arith.constant 0.000000e+00 : f32
    %17 = vector.broadcast %cst_14 : f32 to vector<8x32xf32>
    %18 = vector.extract_strided_slice %10 {offsets = [0, 0], sizes = [8, 8], strides = [1, 1]} : vector<8x32xbf16> to vector<8x8xbf16>
    %19 = vector.extract_strided_slice %16 {offsets = [0, 0], sizes = [8, 8], strides = [1, 1]} : vector<8x64xbf16> to vector<8x8xbf16>
    %20 = vector.extract_strided_slice %16 {offsets = [0, 32], sizes = [8, 8], strides = [1, 1]} : vector<8x64xbf16> to vector<8x8xbf16>
    %cst_15 = arith.constant dense<0.000000e+00> : vector<8x8xf32>
    %21 = tpu.matmul %18, %19, %cst_15 {dimension_numbers = #tpu.dot_dimension_numbers<[1], [1], [0], [0], [0, 0, 1, 0], [], []>} : vector<8x8xbf16>, vector<8x8xbf16>, vector<8x8xf32> -> vector<8x8xf32>
    %cst_16 = arith.constant dense<0xFF800000> : vector<8xf32>
    %22 = vector.multi_reduction <maximumf>, %21, %cst_16 [1] : vector<8x8xf32> to vector<8xf32>
    %23 = vector.shape_cast %22 : vector<8xf32> to vector<8x1xf32>
    %24 = vector.broadcast %23 : vector<8x1xf32> to vector<8x8xf32>
    %25 = arith.subf %21, %24 : vector<8x8xf32>
    %26 = math.exp %25 : vector<8x8xf32>
    %cst_17 = arith.constant dense<0.000000e+00> : vector<8xf32>
    %27 = vector.multi_reduction <add>, %26, %cst_17 [1] : vector<8x8xf32> to vector<8xf32>
    %28 = vector.shape_cast %27 : vector<8xf32> to vector<8x1xf32>
    %29 = tpu.reciprocal %28 {approx = true} : vector<8x1xf32> -> vector<8x1xf32>
    %30 = vector.broadcast %29 : vector<8x1xf32> to vector<8x8xf32>
    %31 = arith.mulf %26, %30 : vector<8x8xf32>
    %32 = arith.truncf %31 : vector<8x8xf32> to vector<8x8xbf16>
    %cst_18 = arith.constant dense<0.000000e+00> : vector<8x8xf32>
    %33 = tpu.matmul %32, %20, %cst_18 {dimension_numbers = #tpu.dot_dimension_numbers<[1], [0], [0], [1], [0, 0, 1, 1], [], []>} : vector<8x8xbf16>, vector<8x8xbf16>, vector<8x8xf32> -> vector<8x8xf32>
    %34 = arith.truncf %33 : vector<8x8xf32> to vector<8x8xbf16>
    %c0_19 = arith.constant 0 : index
    %c0_20 = arith.constant 0 : index
    %35 = vector.load %arg8[%c0_19, %c0_20] : memref<32x32xbf16, #tpu.memory_space<vmem>>, vector<8x32xbf16>
    %cst_21 = arith.constant dense<0.000000e+00> : vector<8x32xf32>
    %36 = tpu.matmul %34, %35, %cst_21 {dimension_numbers = #tpu.dot_dimension_numbers<[1], [0], [0], [1], [0, 0, 1, 1], [], []>} : vector<8x8xbf16>, vector<8x32xbf16>, vector<8x32xf32> -> vector<8x32xf32>
    %37 = arith.addf %17, %36 : vector<8x32xf32>
    %38 = vector.extract_strided_slice %10 {offsets = [0, 8], sizes = [8, 8], strides = [1, 1]} : vector<8x32xbf16> to vector<8x8xbf16>
    %39 = vector.extract_strided_slice %16 {offsets = [0, 8], sizes = [8, 8], strides = [1, 1]} : vector<8x64xbf16> to vector<8x8xbf16>
    %40 = vector.extract_strided_slice %16 {offsets = [0, 40], sizes = [8, 8], strides = [1, 1]} : vector<8x64xbf16> to vector<8x8xbf16>
    %cst_22 = arith.constant dense<0.000000e+00> : vector<8x8xf32>
    %41 = tpu.matmul %38, %39, %cst_22 {dimension_numbers = #tpu.dot_dimension_numbers<[1], [1], [0], [0], [0, 0, 1, 0], [], []>} : vector<8x8xbf16>, vector<8x8xbf16>, vector<8x8xf32> -> vector<8x8xf32>
    %cst_23 = arith.constant dense<0xFF800000> : vector<8xf32>
    %42 = vector.multi_reduction <maximumf>, %41, %cst_23 [1] : vector<8x8xf32> to vector<8xf32>
    %43 = vector.shape_cast %42 : vector<8xf32> to vector<8x1xf32>
    %44 = vector.broadcast %43 : vector<8x1xf32> to vector<8x8xf32>
    %45 = arith.subf %41, %44 : vector<8x8xf32>
    %46 = math.exp %45 : vector<8x8xf32>
    %cst_24 = arith.constant dense<0.000000e+00> : vector<8xf32>
    %47 = vector.multi_reduction <add>, %46, %cst_24 [1] : vector<8x8xf32> to vector<8xf32>
    %48 = vector.shape_cast %47 : vector<8xf32> to vector<8x1xf32>
    %49 = tpu.reciprocal %48 {approx = true} : vector<8x1xf32> -> vector<8x1xf32>
    %50 = vector.broadcast %49 : vector<8x1xf32> to vector<8x8xf32>
    %51 = arith.mulf %46, %50 : vector<8x8xf32>
    %52 = arith.truncf %51 : vector<8x8xf32> to vector<8x8xbf16>
    %cst_25 = arith.constant dense<0.000000e+00> : vector<8x8xf32>
    %53 = tpu.matmul %52, %40, %cst_25 {dimension_numbers = #tpu.dot_dimension_numbers<[1], [0], [0], [1], [0, 0, 1, 1], [], []>} : vector<8x8xbf16>, vector<8x8xbf16>, vector<8x8xf32> -> vector<8x8xf32>
    %54 = arith.truncf %53 : vector<8x8xf32> to vector<8x8xbf16>
    %c8 = arith.constant 8 : index
    %c0_26 = arith.constant 0 : index
    %55 = vector.load %arg8[%c8, %c0_26] : memref<32x32xbf16, #tpu.memory_space<vmem>>, vector<8x32xbf16>
    %cst_27 = arith.constant dense<0.000000e+00> : vector<8x32xf32>
    %56 = tpu.matmul %54, %55, %cst_27 {dimension_numbers = #tpu.dot_dimension_numbers<[1], [0], [0], [1], [0, 0, 1, 1], [], []>} : vector<8x8xbf16>, vector<8x32xbf16>, vector<8x32xf32> -> vector<8x32xf32>
    %57 = arith.addf %37, %56 : vector<8x32xf32>
    %58 = vector.extract_strided_slice %10 {offsets = [0, 16], sizes = [8, 8], strides = [1, 1]} : vector<8x32xbf16> to vector<8x8xbf16>
    %59 = vector.extract_strided_slice %16 {offsets = [0, 16], sizes = [8, 8], strides = [1, 1]} : vector<8x64xbf16> to vector<8x8xbf16>
    %60 = vector.extract_strided_slice %16 {offsets = [0, 48], sizes = [8, 8], strides = [1, 1]} : vector<8x64xbf16> to vector<8x8xbf16>
    %cst_28 = arith.constant dense<0.000000e+00> : vector<8x8xf32>
    %61 = tpu.matmul %58, %59, %cst_28 {dimension_numbers = #tpu.dot_dimension_numbers<[1], [1], [0], [0], [0, 0, 1, 0], [], []>} : vector<8x8xbf16>, vector<8x8xbf16>, vector<8x8xf32> -> vector<8x8xf32>
    %cst_29 = arith.constant dense<0xFF800000> : vector<8xf32>
    %62 = vector.multi_reduction <maximumf>, %61, %cst_29 [1] : vector<8x8xf32> to vector<8xf32>
    %63 = vector.shape_cast %62 : vector<8xf32> to vector<8x1xf32>
    %64 = vector.broadcast %63 : vector<8x1xf32> to vector<8x8xf32>
    %65 = arith.subf %61, %64 : vector<8x8xf32>
    %66 = math.exp %65 : vector<8x8xf32>
    %cst_30 = arith.constant dense<0.000000e+00> : vector<8xf32>
    %67 = vector.multi_reduction <add>, %66, %cst_30 [1] : vector<8x8xf32> to vector<8xf32>
    %68 = vector.shape_cast %67 : vector<8xf32> to vector<8x1xf32>
    %69 = tpu.reciprocal %68 {approx = true} : vector<8x1xf32> -> vector<8x1xf32>
    %70 = vector.broadcast %69 : vector<8x1xf32> to vector<8x8xf32>
    %71 = arith.mulf %66, %70 : vector<8x8xf32>
    %72 = arith.truncf %71 : vector<8x8xf32> to vector<8x8xbf16>
    %cst_31 = arith.constant dense<0.000000e+00> : vector<8x8xf32>
    %73 = tpu.matmul %72, %60, %cst_31 {dimension_numbers = #tpu.dot_dimension_numbers<[1], [0], [0], [1], [0, 0, 1, 1], [], []>} : vector<8x8xbf16>, vector<8x8xbf16>, vector<8x8xf32> -> vector<8x8xf32>
    %74 = arith.truncf %73 : vector<8x8xf32> to vector<8x8xbf16>
    %c16 = arith.constant 16 : index
    %c0_32 = arith.constant 0 : index
    %75 = vector.load %arg8[%c16, %c0_32] : memref<32x32xbf16, #tpu.memory_space<vmem>>, vector<8x32xbf16>
    %cst_33 = arith.constant dense<0.000000e+00> : vector<8x32xf32>
    %76 = tpu.matmul %74, %75, %cst_33 {dimension_numbers = #tpu.dot_dimension_numbers<[1], [0], [0], [1], [0, 0, 1, 1], [], []>} : vector<8x8xbf16>, vector<8x32xbf16>, vector<8x32xf32> -> vector<8x32xf32>
    %77 = arith.addf %57, %76 : vector<8x32xf32>
    %78 = vector.extract_strided_slice %10 {offsets = [0, 24], sizes = [8, 8], strides = [1, 1]} : vector<8x32xbf16> to vector<8x8xbf16>
    %79 = vector.extract_strided_slice %16 {offsets = [0, 24], sizes = [8, 8], strides = [1, 1]} : vector<8x64xbf16> to vector<8x8xbf16>
    %80 = vector.extract_strided_slice %16 {offsets = [0, 56], sizes = [8, 8], strides = [1, 1]} : vector<8x64xbf16> to vector<8x8xbf16>
    %cst_34 = arith.constant dense<0.000000e+00> : vector<8x8xf32>
    %81 = tpu.matmul %78, %79, %cst_34 {dimension_numbers = #tpu.dot_dimension_numbers<[1], [1], [0], [0], [0, 0, 1, 0], [], []>} : vector<8x8xbf16>, vector<8x8xbf16>, vector<8x8xf32> -> vector<8x8xf32>
    %cst_35 = arith.constant dense<0xFF800000> : vector<8xf32>
    %82 = vector.multi_reduction <maximumf>, %81, %cst_35 [1] : vector<8x8xf32> to vector<8xf32>
    %83 = vector.shape_cast %82 : vector<8xf32> to vector<8x1xf32>
    %84 = vector.broadcast %83 : vector<8x1xf32> to vector<8x8xf32>
    %85 = arith.subf %81, %84 : vector<8x8xf32>
    %86 = math.exp %85 : vector<8x8xf32>
    %cst_36 = arith.constant dense<0.000000e+00> : vector<8xf32>
    %87 = vector.multi_reduction <add>, %86, %cst_36 [1] : vector<8x8xf32> to vector<8xf32>
    %88 = vector.shape_cast %87 : vector<8xf32> to vector<8x1xf32>
    %89 = tpu.reciprocal %88 {approx = true} : vector<8x1xf32> -> vector<8x1xf32>
    %90 = vector.broadcast %89 : vector<8x1xf32> to vector<8x8xf32>
    %91 = arith.mulf %86, %90 : vector<8x8xf32>
    %92 = arith.truncf %91 : vector<8x8xf32> to vector<8x8xbf16>
    %cst_37 = arith.constant dense<0.000000e+00> : vector<8x8xf32>
    %93 = tpu.matmul %92, %80, %cst_37 {dimension_numbers = #tpu.dot_dimension_numbers<[1], [0], [0], [1], [0, 0, 1, 1], [], []>} : vector<8x8xbf16>, vector<8x8xbf16>, vector<8x8xf32> -> vector<8x8xf32>
    %94 = arith.truncf %93 : vector<8x8xf32> to vector<8x8xbf16>
    %c24 = arith.constant 24 : index
    %c0_38 = arith.constant 0 : index
    %95 = vector.load %arg8[%c24, %c0_38] : memref<32x32xbf16, #tpu.memory_space<vmem>>, vector<8x32xbf16>
    %cst_39 = arith.constant dense<0.000000e+00> : vector<8x32xf32>
    %96 = tpu.matmul %94, %95, %cst_39 {dimension_numbers = #tpu.dot_dimension_numbers<[1], [0], [0], [1], [0, 0, 1, 1], [], []>} : vector<8x8xbf16>, vector<8x32xbf16>, vector<8x32xf32> -> vector<8x32xf32>
    %97 = arith.addf %77, %96 : vector<8x32xf32>
    %c0_40 = arith.constant 0 : index
    %c0_41 = arith.constant 0 : index
    %98 = vector.load %arg9[%c0_40, %c0_41] : memref<1x32xf32, #tpu.memory_space<vmem>>, vector<1x32xf32>
    %99 = vector.broadcast %98 : vector<1x32xf32> to vector<8x32xf32>
    %100 = arith.addf %97, %99 : vector<8x32xf32>
    %101 = arith.addf %1, %100 : vector<8x32xf32>
    %cst_42 = arith.constant dense<0.000000e+00> : vector<8xf32>
    %102 = vector.multi_reduction <add>, %101, %cst_42 [1] : vector<8x32xf32> to vector<8xf32>
    %103 = vector.shape_cast %102 : vector<8xf32> to vector<8x1xf32>
    %cst_43 = arith.constant 3.200000e+01 : f32
    %104 = vector.broadcast %cst_43 : f32 to vector<8x1xf32>
    %105 = arith.divf %103, %104 : vector<8x1xf32>
    %106 = vector.broadcast %105 : vector<8x1xf32> to vector<8x32xf32>
    %107 = arith.subf %101, %106 : vector<8x32xf32>
    %108 = arith.mulf %107, %107 : vector<8x32xf32>
    %cst_44 = arith.constant dense<0.000000e+00> : vector<8xf32>
    %109 = vector.multi_reduction <add>, %108, %cst_44 [1] : vector<8x32xf32> to vector<8xf32>
    %110 = vector.shape_cast %109 : vector<8xf32> to vector<8x1xf32>
    %cst_45 = arith.constant 3.200000e+01 : f32
    %111 = vector.broadcast %cst_45 : f32 to vector<8x1xf32>
    %112 = arith.divf %110, %111 : vector<8x1xf32>
    %113 = vector.broadcast %105 : vector<8x1xf32> to vector<8x32xf32>
    %114 = arith.subf %101, %113 : vector<8x32xf32>
    %cst_46 = arith.constant 9.99999974E-6 : f32
    %115 = vector.broadcast %cst_46 : f32 to vector<8x1xf32>
    %116 = arith.addf %112, %115 : vector<8x1xf32>
    %117 = math.rsqrt %116 : vector<8x1xf32>
    %118 = vector.broadcast %117 : vector<8x1xf32> to vector<8x32xf32>
    %119 = arith.mulf %114, %118 : vector<8x32xf32>
    %c0_47 = arith.constant 0 : index
    %c0_48 = arith.constant 0 : index
    %120 = vector.load %arg10[%c0_47, %c0_48] : memref<1x32xf32, #tpu.memory_space<vmem>>, vector<1x32xf32>
    %121 = vector.broadcast %120 : vector<1x32xf32> to vector<8x32xf32>
    %122 = arith.mulf %119, %121 : vector<8x32xf32>
    %c0_49 = arith.constant 0 : index
    %c0_50 = arith.constant 0 : index
    %123 = vector.load %arg11[%c0_49, %c0_50] : memref<1x32xf32, #tpu.memory_space<vmem>>, vector<1x32xf32>
    %124 = vector.broadcast %123 : vector<1x32xf32> to vector<8x32xf32>
    %125 = arith.addf %122, %124 : vector<8x32xf32>
    %126 = arith.truncf %125 : vector<8x32xf32> to vector<8x32xbf16>
    %c0_51 = arith.constant 0 : index
    %c0_52 = arith.constant 0 : index
    %127 = vector.load %arg12[%c0_51, %c0_52] : memref<32x64xbf16, #tpu.memory_space<vmem>>, vector<32x64xbf16>
    %cst_53 = arith.constant dense<0.000000e+00> : vector<8x64xf32>
    %128 = tpu.matmul %126, %127, %cst_53 {dimension_numbers = #tpu.dot_dimension_numbers<[1], [0], [0], [1], [0, 0, 1, 1], [], []>} : vector<8x32xbf16>, vector<32x64xbf16>, vector<8x64xf32> -> vector<8x64xf32>
    %c0_54 = arith.constant 0 : index
    %c0_55 = arith.constant 0 : index
    %129 = vector.load %arg13[%c0_54, %c0_55] : memref<1x64xf32, #tpu.memory_space<vmem>>, vector<1x64xf32>
    %130 = vector.broadcast %129 : vector<1x64xf32> to vector<8x64xf32>
    %131 = arith.addf %128, %130 : vector<8x64xf32>
    %cst_56 = arith.constant 0.000000e+00 : f32
    %132 = vector.broadcast %cst_56 : f32 to vector<8x64xf32>
    %133 = arith.maximumf %131, %132 : vector<8x64xf32>
    %134 = arith.truncf %133 : vector<8x64xf32> to vector<8x64xbf16>
    %c0_57 = arith.constant 0 : index
    %c0_58 = arith.constant 0 : index
    %135 = vector.load %arg14[%c0_57, %c0_58] : memref<64x32xbf16, #tpu.memory_space<vmem>>, vector<64x32xbf16>
    %cst_59 = arith.constant dense<0.000000e+00> : vector<8x32xf32>
    %136 = tpu.matmul %134, %135, %cst_59 {dimension_numbers = #tpu.dot_dimension_numbers<[1], [0], [0], [1], [0, 0, 1, 1], [], []>} : vector<8x64xbf16>, vector<64x32xbf16>, vector<8x32xf32> -> vector<8x32xf32>
    %c0_60 = arith.constant 0 : index
    %c0_61 = arith.constant 0 : index
    %137 = vector.load %arg15[%c0_60, %c0_61] : memref<1x32xf32, #tpu.memory_space<vmem>>, vector<1x32xf32>
    %138 = vector.broadcast %137 : vector<1x32xf32> to vector<8x32xf32>
    %139 = arith.addf %136, %138 : vector<8x32xf32>
    %140 = arith.addf %125, %139 : vector<8x32xf32>
    %cst_62 = arith.constant dense<0.000000e+00> : vector<8xf32>
    %141 = vector.multi_reduction <add>, %140, %cst_62 [1] : vector<8x32xf32> to vector<8xf32>
    %142 = vector.shape_cast %141 : vector<8xf32> to vector<8x1xf32>
    %cst_63 = arith.constant 3.200000e+01 : f32
    %143 = vector.broadcast %cst_63 : f32 to vector<8x1xf32>
    %144 = arith.divf %142, %143 : vector<8x1xf32>
    %145 = vector.broadcast %144 : vector<8x1xf32> to vector<8x32xf32>
    %146 = arith.subf %140, %145 : vector<8x32xf32>
    %147 = arith.mulf %146, %146 : vector<8x32xf32>
    %cst_64 = arith.constant dense<0.000000e+00> : vector<8xf32>
    %148 = vector.multi_reduction <add>, %147, %cst_64 [1] : vector<8x32xf32> to vector<8xf32>
    %149 = vector.shape_cast %148 : vector<8xf32> to vector<8x1xf32>
    %cst_65 = arith.constant 3.200000e+01 : f32
    %150 = vector.broadcast %cst_65 : f32 to vector<8x1xf32>
    %151 = arith.divf %149, %150 : vector<8x1xf32>
    %152 = vector.broadcast %144 : vector<8x1xf32> to vector<8x32xf32>
    %153 = arith.subf %140, %152 : vector<8x32xf32>
    %cst_66 = arith.constant 9.99999974E-6 : f32
    %154 = vector.broadcast %cst_66 : f32 to vector<8x1xf32>
    %155 = arith.addf %151, %154 : vector<8x1xf32>
    %156 = math.rsqrt %155 : vector<8x1xf32>
    %157 = vector.broadcast %156 : vector<8x1xf32> to vector<8x32xf32>
    %158 = arith.mulf %153, %157 : vector<8x32xf32>
    %c0_67 = arith.constant 0 : index
    %c0_68 = arith.constant 0 : index
    %159 = vector.load %arg16[%c0_67, %c0_68] : memref<1x32xf32, #tpu.memory_space<vmem>>, vector<1x32xf32>
    %160 = vector.broadcast %159 : vector<1x32xf32> to vector<8x32xf32>
    %161 = arith.mulf %158, %160 : vector<8x32xf32>
    %c0_69 = arith.constant 0 : index
    %c0_70 = arith.constant 0 : index
    %162 = vector.load %arg17[%c0_69, %c0_70] : memref<1x32xf32, #tpu.memory_space<vmem>>, vector<1x32xf32>
    %163 = vector.broadcast %162 : vector<1x32xf32> to vector<8x32xf32>
    %164 = arith.addf %161, %163 : vector<8x32xf32>
    %c0_71 = arith.constant 0 : index
    %c0_72 = arith.constant 0 : index
    %c0_73 = arith.constant 0 : index
    %165 = vector.load %arg18[%c0_71, %c0_72, %c0_73] : memref<1x8x32xf32, #tpu.memory_space<vmem>>, vector<1x8x32xf32>
    %166 = vector.shape_cast %165 : vector<1x8x32xf32> to vector<8x32xf32>
    %167 = vector.shape_cast %164 : vector<8x32xf32> to vector<1x8x32xf32>
    tpu.vector_store %arg18[%c0_71, %c0_72, %c0_73], %167 {strides = array<i32>} : memref<1x8x32xf32, #tpu.memory_space<vmem>>, vector<1x8x32xf32>,
    return
  }
  func.func @transform_0(%arg0: i32, %arg1: i32) -> (i32, i32, i32) {
    %c0_i32 = arith.constant 0 : i32
    %c0_i32_0 = arith.constant 0 : i32
    return %arg0, %arg1, %c0_i32 : i32, i32, i32
  }
  func.func @transform_1(%arg0: i32, %arg1: i32) -> (i32, i32, i32) {
    %c0_i32 = arith.constant 0 : i32
    %c0_i32_0 = arith.constant 0 : i32
    %c0_i32_1 = arith.constant 0 : i32
    return %arg0, %c0_i32, %c0_i32_0 : i32, i32, i32
  }
  func.func @transform_2(%arg0: i32, %arg1: i32) -> (i32, i32) {
    %c0_i32 = arith.constant 0 : i32
    %c0_i32_0 = arith.constant 0 : i32
    %c0_i32_1 = arith.constant 0 : i32
    return %c0_i32, %c0_i32_0 : i32, i32
  }
  func.func @transform_3(%arg0: i32, %arg1: i32) -> (i32, i32) {
    %c0_i32 = arith.constant 0 : i32
    %c0_i32_0 = arith.constant 0 : i32
    %c0_i32_1 = arith.constant 0 : i32
    return %c0_i32, %c0_i32_0 : i32, i32
  }
  func.func @transform_4(%arg0: i32, %arg1: i32) -> (i32, i32) {
    %c0_i32 = arith.constant 0 : i32
    %c0_i32_0 = arith.constant 0 : i32
    %c0_i32_1 = arith.constant 0 : i32
    return %c0_i32, %c0_i32_0 : i32, i32
  }
  func.func @transform_5(%arg0: i32, %arg1: i32) -> (i32, i32) {
    %c0_i32 = arith.constant 0 : i32
    %c0_i32_0 = arith.constant 0 : i32
    %c0_i32_1 = arith.constant 0 : i32
    return %c0_i32, %c0_i32_0 : i32, i32
  }
  func.func @transform_6(%arg0: i32, %arg1: i32) -> (i32, i32) {
    %c0_i32 = arith.constant 0 : i32
    %c0_i32_0 = arith.constant 0 : i32
    %c0_i32_1 = arith.constant 0 : i32
    return %c0_i32, %c0_i32_0 : i32, i32
  }
  func.func @transform_7(%arg0: i32, %arg1: i32) -> (i32, i32) {
    %c0_i32 = arith.constant 0 : i32
    %c0_i32_0 = arith.constant 0 : i32
    %c0_i32_1 = arith.constant 0 : i32
    return %c0_i32, %c0_i32_0 : i32, i32
  }
  func.func @transform_8(%arg0: i32, %arg1: i32) -> (i32, i32) {
    %c0_i32 = arith.constant 0 : i32
    %c0_i32_0 = arith.constant 0 : i32
    %c0_i32_1 = arith.constant 0 : i32
    return %c0_i32, %c0_i32_0 : i32, i32
  }
  func.func @transform_9(%arg0: i32, %arg1: i32) -> (i32, i32) {
    %c0_i32 = arith.constant 0 : i32
    %c0_i32_0 = arith.constant 0 : i32
    %c0_i32_1 = arith.constant 0 : i32
    return %c0_i32, %c0_i32_0 : i32, i32
  }
  func.func @transform_10(%arg0: i32, %arg1: i32) -> (i32, i32) {
    %c0_i32 = arith.constant 0 : i32
    %c0_i32_0 = arith.constant 0 : i32
    %c0_i32_1 = arith.constant 0 : i32
    return %c0_i32, %c0_i32_0 : i32, i32
  }
  func.func @transform_11(%arg0: i32, %arg1: i32) -> (i32, i32) {
    %c0_i32 = arith.constant 0 : i32
    %c0_i32_0 = arith.constant 0 : i32
    %c0_i32_1 = arith.constant 0 : i32
    return %c0_i32, %c0_i32_0 : i32, i32
  }
  func.func @transform_12(%arg0: i32, %arg1: i32) -> (i32, i32) {
    %c0_i32 = arith.constant 0 : i32
    %c0_i32_0 = arith.constant 0 : i32
    %c0_i32_1 = arith.constant 0 : i32
    return %c0_i32, %c0_i32_0 : i32, i32
  }
  func.func @transform_13(%arg0: i32, %arg1: i32) -> (i32, i32) {
    %c0_i32 = arith.constant 0 : i32
    %c0_i32_0 = arith.constant 0 : i32
    %c0_i32_1 = arith.constant 0 : i32
    return %c0_i32, %c0_i32_0 : i32, i32
  }
  func.func @transform_14(%arg0: i32, %arg1: i32) -> (i32, i32) {
    %c0_i32 = arith.constant 0 : i32
    %c0_i32_0 = arith.constant 0 : i32
    %c0_i32_1 = arith.constant 0 : i32
    return %c0_i32, %c0_i32_0 : i32, i32
  }
  func.func @transform_15(%arg0: i32, %arg1: i32) -> (i32, i32) {
    %c0_i32 = arith.constant 0 : i32
    %c0_i32_0 = arith.constant 0 : i32
    %c0_i32_1 = arith.constant 0 : i32
    return %c0_i32, %c0_i32_0 : i32, i32
  }
  func.func @transform_16(%arg0: i32, %arg1: i32) -> (i32, i32, i32) {
    %c0_i32 = arith.constant 0 : i32
    %c0_i32_0 = arith.constant 0 : i32
    return %arg0, %arg1, %c0_i32 : i32, i32, i32
  }
}

</mosaic_0001>

<bundles_post_ra>
// kernel: tpu_custom_call.1
= control target key start
LH: loop header
LB: loop body
LE: loop exit
PB: predicated region body
PF: predicated region fallthrough
CT: control target
= control target key end

     0   :  { %6 = vsyncpa [#allocation3], 0  ;;  %s124_s0 = inlined_call_operand.hbm [shape: f32[8,128], index: 0, kind: input, shape index: {}]   ;;  %s125_s1 = inlined_call_operand.hbm [shape: f32[8,128], index: 1, kind: output, shape index: {}]  }
   0x1   :  { %7 = vsyncpa [#allocation4], 0  ;;  %s88_s6 = smov [#allocation2]   ;;  %s40_s10 = scalar_lea.hbm %s124_s0, 128 }
   0x2   :  { %s14_s7 = sshll.u32 %s88_s6, 4  ;;  %p41_p0 = scmp.ne.s32.totalorder %s124_s0, %s40_s10  ;;  %s15_s7 = int_to_ptr.vmem [resolvable:$true] %s14_s7 }
   0x3   :  { %p44_p1 = scmp.lt.u32.totalorder %s40_s10, %s124_s0 }
   0x5   :  { %p46_p2 = pnand %p44_p1, %p41_p0 }
   0x7   :  { %49 = shalt.err (!%p46_p2)
}
   0x8   :  { %s50_s15 = scalar_lea.vmem %s15_s7, 128  ;;  %p55_p4 = scmp.lt.s32.totalorder %s15_s7, %s15_s7 }
   0x9   :  { %p51_p3 = scmp.ne.s32.totalorder %s15_s7, %s50_s15  ;;  %p56_p5 = scmp.lt.s32.totalorder %s50_s15, %s50_s15 }
   0xb   :  { %p57_p6 = por %p56_p5, %p55_p4 }
   0xd   :  { %p58_p7 = pnand %p57_p6, %p51_p3 }
   0xf   :  { %61 = shalt.err (!%p58_p7)
}
  0x10   :  { %17 = dma.hbm_to_vmem [thread:$0]  %s124_s0, 128, %s15_s7, [#allocation3]  }
  0x11   :  { %84 = dma.done.wait [#allocation3], 128  }
  0x12   :  { %85 = vsyncadd [#allocation3], 4294967168  ;;  %s89_s18 = smov [#allocation5]   ;;  %v21_v0 = vld [vmem:[#allocation2] sm:$0xff] }
  0x13   :  { %s29_s19 = sshll.u32 %s89_s18, 4  ;;  %22 = vst [vmem:[#allocation5] sm:$0xff] %v21_v0  ;;  %s30_s19 = int_to_ptr.vmem [resolvable:$true] %s29_s19 }
  0x14   :  { %s62_s20 = scalar_lea.vmem %s30_s19, 128  ;;  %p67_p9 = scmp.lt.s32.totalorder %s30_s19, %s30_s19 }
  0x15   :  { %p63_p8 = scmp.ne.s32.totalorder %s30_s19, %s62_s20  ;;  %p68_p10 = scmp.lt.s32.totalorder %s62_s20, %s62_s20 }
  0x17   :  { %p69_p11 = por %p68_p10, %p67_p9 }
  0x19   :  { %p70_p12 = pnand %p69_p11, %p63_p8 }
  0x1b   :  { %73 = shalt.err (!%p70_p12)
}
  0x1c   :  { %s74_s23 = scalar_lea.hbm %s125_s1, 128 }
  0x1d   :  { %p75_p13 = scmp.ne.s32.totalorder %s125_s1, %s74_s23  ;;  %p78_p0 = scmp.lt.u32.totalorder %s74_s23, %s125_s1 }
  0x1f   :  { %p80_p1 = pnand %p78_p0, %p75_p13 }
  0x21   :  { %83 = shalt.err (!%p80_p1)
}
  0x22   :  { %32 = dma.vmem_to_hbm [thread:$0]  %s30_s19, 128, %s125_s1, [#allocation4]  }
  0x23   :  { %86 = dma.done.wait [#allocation4], 128  }
  0x24   :  { %87 = vsyncadd [#allocation4], 4294967168 }
  0x25   :  { %36 = vsyncpa [#allocation3], 1 }
  0x26   :  { %37 = vsyncpa [#allocation4], 1 }

// kernel: tpu_custom_call.1
= control target key start
LH: loop header
LB: loop body
LE: loop exit
PB: predicated region body
PF: predicated region fallthrough
CT: control target
= control target key end

     0   :  { %s2924_s0 = inlined_call_operand.vmem [shape: f32[2,8,32], index: 0, kind: input, shape index: {}]   ;;  %s2925_s1 = inlined_call_operand.hbm [shape: bf16[2,8,32], index: 1, kind: input, shape index: {}]   ;;  %s2926_s2 = inlined_call_operand.vmem [shape: bf16[32,32], index: 2, kind: input, shape index: {}]   ;;  %s2927_s3 = inlined_call_operand.vmem [shape: f32[1,32], index: 3, kind: input, shape index: {}]   ;;  %s2928_s4 = inlined_call_operand.vmem [shape: bf16[32,64], index: 4, kind: input, shape index: {}]   ;;  %s2929_s5 = inlined_call_operand.vmem [shape: f32[1,64], index: 5, kind: input, shape index: {}]   ;;  %s2930_s6 = inlined_call_operand.hbm [shape: bf16[32,32], index: 6, kind: input, shape index: {}]   ;;  %s2931_s7 = inlined_call_operand.hbm [shape: f32[1,32], index: 7, kind: input, shape index: {}]   ;;  %s2932_s8 = inlined_call_operand.hbm [shape: f32[1,32], index: 8, kind: input, shape index: {}]   ;;  %s2933_s9 = inlined_call_operand.hbm [shape: f32[1,32], index: 9, kind: input, shape index: {}]   ;;  %s2934_s10 = inlined_call_operand.vmem [shape: bf16[32,64], index: 10, kind: input, shape index: {}]   ;;  %s2935_s11 = inlined_call_operand.vmem [shape: f32[1,64], index: 11, kind: input, shape index: {}]   ;;  %s2936_s12 = inlined_call_operand.vmem [shape: bf16[64,32], index: 12, kind: input, shape index: {}]   ;;  %s2937_s13 = inlined_call_operand.vmem [shape: f32[1,32], index: 13, kind: input, shape index: {}]   ;;  %s2938_s14 = inlined_call_operand.vmem [shape: f32[1,32], index: 14, kind: input, shape index: {}]   ;;  %s2939_s15 = inlined_call_operand.vmem [shape: f32[1,32], index: 15, kind: input, shape index: {}]   ;;  %s2940_s16 = inlined_call_operand.hbm [shape: f32[2,8,32], index: 16, kind: output, shape index: {}]  }
   0x1   :  { %2949 = sst [smem:[#allocation16_spill]] %s2924_s0 }
   0x2   :  { %2950 = sst [smem:[#allocation17_spill]] %s2925_s1 }
   0x3   :  { %2951 = sst [smem:[#allocation18_spill]] %s2926_s2 }
   0x4   :  { %2952 = sst [smem:[#allocation19_spill]] %s2927_s3 }
   0x5   :  { %2953 = sst [smem:[#allocation20_spill]] %s2929_s5 }
   0x6   :  { %2954 = sst [smem:[#allocation21_spill]] %s2930_s6 }
   0x7   :  { %2955 = sst [smem:[#allocation22_spill]] %s2934_s10 }
   0x8   :  { %2956 = sst [smem:[#allocation23_spill]] %s2935_s11 }
   0x9   :  { %2957 = sst [smem:[#allocation24_spill]] %s2936_s12 }
   0xa   :  { %2958 = sst [smem:[#allocation25_spill]] %s2937_s13 }
   0xb   :  { %2959 = sst [smem:[#allocation26_spill]] %s2938_s14 }
   0xc   :  { %2960 = sst [smem:[#allocation27_spill]] %s2939_s15 }
   0xd   :  { %2961 = sst [smem:[#allocation28_spill]] %s2940_s16 }
   0xe   :  { %21 = vsyncpa [#allocation3], 0 }
   0xf   :  { %23 = vsyncpa [#allocation3 + $0x1], 0 }
  0x10   :  { %24 = vsyncpa [#allocation6], 0 }
  0x11   :  { %25 = vsyncpa [#allocation9], 0 }
  0x12   :  { %26 = vsyncpa [#allocation4], 0 }
  0x13   :  { %28 = vsyncpa [#allocation4 + $0x1], 0  ;;  %s2456_s21 = smov 0   ;;  %s2458_s22 = smov 0  }
  0x14   :  { %s2460_s23 = smov 0   ;;  %s2462_s24 = smov 0  }
  0x15   :  { %s2464_s25 = smov 0   ;;  %s2466_s26 = smov 0  }
  0x16 LB: > { %s2941_s27 = sadd.s32 4294967295, %s2352_s26   ;;  %p1775_p0 = scmp.ge.s32.totalorder %s2352_s26, 1  ;;  %s2352_s26 = sphi %s2466_s26, %s34_s26   ;;  %s2348_s25 = sphi %s2464_s25, %s2995_s25   ;;  %s2344_s24 = sphi %s2462_s24, %s2994_s24   ;;  %s2340_s23 = sphi %s2460_s23, %s2993_s23   ;;  %s2336_s22 = sphi %s2458_s22, %s2992_s22   ;;  %s2332_s21 = sphi %s2456_s21, %s2991_s21  }
  0x17   : > { %p2490_p1 = scmp.eq.s32.totalorder %s2941_s27, 0  ;;  %p427_p2 = scmp.lt.s32.totalorder %s2352_s26, 3 }
  0x18   : > { %s2354_s30 = smov [#allocation5]   ;;  %s2355_s18 = smov [#allocation8]  }
  0x19   : > { %s2962_s28 = scalar_select %p2490_p1, 1, 0 }
  0x1a   : > { %p2495_p3 = pnand %p1775_p0, %p427_p2  ;;  %s451_s0 = sshll.u32 %s2354_s30, 4  ;;  %s2499_s0 = int_to_ptr.vmem [resolvable:$true] %s451_s0 }
  0x1b   : > { %s476_s19 = sshll.u32 %s2355_s18, 4  ;;  %s2356_s20 = smov [#allocation7]   ;;  %s2510_s19 = int_to_ptr.vmem [resolvable:$true] %s476_s19 }
  0x1c   : > { %s2963_s29 = scalar_select %p2495_p3, 1, 0 }
  0x1d   : > { %p1996_p4 = pneg %p2495_p3  ;;  %s2512_s27 = sshll.u32 %s2356_s20, 4  ;;  %s466_s27 = int_to_ptr.vmem [resolvable:$true] %s2512_s27 }
  0x1e   : > { %s2965_s6 = sld [smem:[#allocation21_spill]] }
  0x1f   : > { %p2506_p6 = pnand %p1996_p4, %p2490_p1 }
  0x21   : > { %p2522_p8 = pneg %p2506_p6 }
  0x24   : > { %s2120_s15 = scalar_lea.hbm %s2965_s6, 256 }
  0x25   : > { %p2121_p7 = scmp.ne.s32.totalorder %s2965_s6, %s2120_s15  ;;  %p2127_p11 = scmp.lt.u32.totalorder %s2120_s15, %s2965_s6 }
  0x27   : > { %p2123_p9 = pnand %p2522_p8, %p2121_p7 }
  0x29   : > { %p2124_p10 = pneg %p2123_p9 }
  0x2b   : > { %p2129_p12 = pnand %p2127_p11, %p2124_p10 }
  0x2d   : > { %2132 = shalt.err (!%p2129_p12)
}
  0x2e   : > { %s2133_s13 = scalar_lea.vmem %s2499_s0, 256  ;;  %p2141_p4 = scmp.lt.s32.totalorder %s2499_s0, %s2499_s0 }
  0x2f   : > { %p2134_p13 = scmp.ne.s32.totalorder %s2499_s0, %s2133_s13  ;;  %p2142_p5 = scmp.lt.s32.totalorder %s2133_s13, %s2133_s13 }
  0x31   : > { %p2136_p0 = pnand %p2134_p13, %p2522_p8  ;;  %p2143_p7 = por %p2142_p5, %p2141_p4 }
  0x33   : > { %p2137_p2 = pneg %p2136_p0 }
  0x35   : > { %p2144_p9 = pnand %p2143_p7, %p2137_p2 }
  0x37   : > { %2147 = shalt.err (!%p2144_p9)
}
  0x38   : > { %s2357_s14 = smov 64   ;;  %s2358_s15 = smov 4  }
  0x39   : > { %1999 = dma.hbm_to_vmem [thread:$0]  (!%p2506_p6), %s2965_s6, 256, %s2499_s0, [#allocation6], %s2357_s14, %s2357_s14, %s2358_s15  }
  0x3a   : > { %s2148_s12 = scalar_lea.hbm %s2932_s8, 16 }
  0x3b   : > { %p2149_p5 = scmp.ne.s32.totalorder %s2932_s8, %s2148_s12  ;;  %p2155_p12 = scmp.lt.u32.totalorder %s2148_s12, %s2932_s8 }
  0x3d   : > { %p2151_p10 = pnand %p2149_p5, %p2522_p8 }
  0x3f   : > { %p2152_p11 = pneg %p2151_p10 }
  0x41   : > { %p2157_p13 = pnand %p2155_p12, %p2152_p11 }
  0x43   : > { %2160 = shalt.err (!%p2157_p13)
}
  0x44   : > { %s2161_s0 = scalar_lea.vmem %s2510_s19, 16  ;;  %s2168_s3 = scalar_lea.vmem %s2510_s19, 32 }
  0x45   : > { %p2162_p0 = scmp.ne.s32.totalorder %s2510_s19, %s2161_s0  ;;  %p2169_p7 = scmp.lt.s32.totalorder %s2510_s19, %s2510_s19 }
  0x46   : > { %p2170_p9 = scmp.lt.s32.totalorder %s2168_s3, %s2161_s0 }
  0x47   : > { %p2164_p2 = pnand %p2162_p0, %p2522_p8 }
  0x48   : > { %p2171_p5 = por %p2170_p9, %p2169_p7 }
  0x49   : > { %p2165_p4 = pneg %p2164_p2 }
  0x4b   : > { %p2172_p10 = pnand %p2171_p5, %p2165_p4 }
  0x4d   : > { %2175 = shalt.err (!%p2172_p10)
}
  0x4e   : > { %2005 = dma.hbm_to_vmem [thread:$0]  (!%p2506_p6), %s2932_s8, 16, %s2510_s19, [#allocation9]  }
  0x4f   : > { %s2176_s15 = scalar_lea.hbm %s2931_s7, 16 }
  0x50   : > { %p2177_p11 = scmp.ne.s32.totalorder %s2931_s7, %s2176_s15  ;;  %p2183_p0 = scmp.lt.u32.totalorder %s2176_s15, %s2931_s7 }
  0x52   : > { %p2179_p12 = pnand %p2177_p11, %p2522_p8 }
  0x54   : > { %p2180_p13 = pneg %p2179_p12 }
  0x56   : > { %p2185_p2 = pnand %p2183_p0, %p2180_p13 }
  0x58   : > { %2188 = shalt.err (!%p2185_p2)
}
  0x59   : > { %s2189_s13 = scalar_lea.vmem %s466_s27, 16  ;;  %s2196_s19 = scalar_lea.vmem %s466_s27, 32 }
  0x5a   : > { %p2190_p4 = scmp.ne.s32.totalorder %s466_s27, %s2189_s13  ;;  %p2197_p5 = scmp.lt.s32.totalorder %s466_s27, %s466_s27 }
  0x5b   : > { %p2198_p10 = scmp.lt.s32.totalorder %s2196_s19, %s2189_s13 }
  0x5c   : > { %p2192_p7 = pnand %p2190_p4, %p2522_p8 }
  0x5d   : > { %p2199_p3 = por %p2198_p10, %p2197_p5 }
  0x5e   : > { %p2193_p9 = pneg %p2192_p7 }
  0x60   : > { %p2200_p1 = pnand %p2199_p3, %p2193_p9 }
  0x62   : > { %2203 = shalt.err (!%p2200_p1)
}
  0x63   : > { %2002 = dma.hbm_to_vmem [thread:$0]  (!%p2506_p6), %s2931_s7, 16, %s466_s27, [#allocation6]  }
  0x64   : > { %s2359_s5 = smov [#allocation10]   ;;  %s2204_s15 = scalar_lea.hbm %s2933_s9, 16 }
  0x65   : > { %s487_s10 = sshll.u32 %s2359_s5, 4  ;;  %p2205_p11 = scmp.ne.s32.totalorder %s2933_s9, %s2204_s15  ;;  %s488_s10 = int_to_ptr.vmem [resolvable:$true] %s487_s10 }
  0x66   : > { %p2211_p12 = scmp.lt.u32.totalorder %s2204_s15, %s2933_s9 }
  0x67   : > { %p2207_p1 = pnand %p2205_p11, %p2522_p8 }
  0x69   : > { %p2208_p3 = pneg %p2207_p1 }
  0x6b   : > { %p2213_p13 = pnand %p2211_p12, %p2208_p3 }
  0x6d   : > { %2216 = shalt.err (!%p2213_p13)
}
  0x6e   : > { %s2217_s27 = scalar_lea.vmem %s488_s10, 16  ;;  %s2224_s13 = scalar_lea.vmem %s488_s10, 32 }
  0x6f   : > { %p2218_p0 = scmp.ne.s32.totalorder %s488_s10, %s2217_s27  ;;  %p2225_p7 = scmp.lt.s32.totalorder %s488_s10, %s488_s10 }
  0x70   : > { %p2226_p9 = scmp.lt.s32.totalorder %s2224_s13, %s2217_s27 }
  0x71   : > { %p2220_p2 = pnand %p2218_p0, %p2522_p8 }
  0x72   : > { %p2227_p5 = por %p2226_p9, %p2225_p7 }
  0x73   : > { %p2221_p4 = pneg %p2220_p2 }
  0x75   : > { %p2228_p10 = pnand %p2227_p5, %p2221_p4 }
  0x77   : > { %2231 = shalt.err (!%p2228_p10)
}
  0x78   : > { %2008 = dma.hbm_to_vmem [thread:$0]  (!%p2506_p6), %s2933_s9, 16, %s488_s10, [#allocation9]  }
  0x79   : > { %s1774_s11 = sadd.s32 4294967294, %s2352_s26   ;;  %s46_s3 = sadd.s32 1, %s2348_s25 }
  0x7a   : > { %p48_p8 = scmp.ge.s32.totalorder %s46_s3, 2  ;;  %s81_s17 = sadd.s32 1, %s2340_s23 }
  0x7b   : > { %p88_p11 = scmp.ne.s32.totalorder %s2340_s23, %s2336_s22  ;;  %p89_p1 = scmp.eq.s32.totalorder %s2352_s26, 0 }
  0x7c   : > { %s2997_s3 = smov (%p48_p8, %s46_s3), 0  ;;  %p94_p12 = scmp.ne.s32.totalorder %s2336_s22, %s2332_s21 }
  0x7d   : > { %p2612_p3 = por %p89_p1, %p88_p11  ;;  %s78_s10 = ssub.s32 %s2348_s25, %s2997_s3 }
  0x7e   : > { %s2968_s12 = sadd.s32 4294967295, %s2352_s26   ;;  %p79_p13 = scmp.eq.s32.totalorder %s78_s10, 0 }
  0x7f   : > { %p414_p6 = scmp.eq.s32.totalorder %s2968_s12, 1  ;;  %p2969_p0 = scmp.ne.s32.totalorder %s2962_s28, 0 }
  0x80   : > { %p420_p7 = scmp.eq.s32.totalorder %s1774_s11, 1  ;;  %p2021_p5 = scmp.lt.s32.totalorder %s2352_s26, 2 }
  0x81   : > { %p2624_p2 = por %p2969_p0, %p94_p12  ;;  %p2628_p4 = por %p414_p6, %p88_p11 }
  0x82   : > { %s2633_s16 = scalar_select %p79_p13, %s2340_s23, %s81_s17  }
  0x83   : > { %s2971_s15 = scalar_select %p2628_p4, 1, 0 }
  0x84   : > { %p2635_p9 = por %p420_p7, %p94_p12  ;;  %s526_s18 = sand.u32 1, %s2340_s23  }
  0x85   : > { %s1782_s20 = sshll.u32 %s2348_s25, 6  ;;  %s1781_s27 = sshll.u32 %s526_s18, 2 }
  0x86   : > { %s2972_s30 = scalar_select %p2635_p9, 1, 0 }
  0x87   : > { %s2973_s1 = sld [smem:[#allocation17_spill]]  ;;  %s530_s11 = scalar_lea.vmem [#allocation2], %s1781_s27 }
  0x88   : > { %s537_s17 = sshll.u32 %s530_s11, 4  ;;  %p2649_p10 = pnand %p2021_p5, %p2612_p3  ;;  %s2653_s17 = int_to_ptr.vmem [resolvable:$true] %s537_s17 }
  0x89   : > { %s527_s12 = scalar_lea.sflag [#allocation3], %s526_s18 }
  0x8a   : > { %p2234_p11 = pneg %p2649_p10 }
  0x8d   : > { %s2645_s0 = scalar_lea.hbm %s2973_s1, %s1782_s20  ;;  %s2237_s5 = scalar_lea.hbm %s2973_s1, 128 }
  0x8e   : > { %s2232_s6 = scalar_lea.hbm %s2645_s0, 64  ;;  %p2238_p3 = scmp.lt.u32.totalorder %s2645_s0, %s2973_s1 }
  0x8f   : > { %p2233_p8 = scmp.ne.s32.totalorder %s2645_s0, %s2232_s6  ;;  %p2239_p6 = scmp.lt.u32.totalorder %s2237_s5, %s2232_s6 }
  0x90   : > { %p2241_p0 = scmp.lt.u32.totalorder %s2232_s6, %s2645_s0 }
  0x91   : > { %p2235_p1 = pnand %p2234_p11, %p2233_p8  ;;  %p2240_p13 = por %p2239_p6, %p2238_p3 }
  0x93   : > { %p2236_p12 = pneg %p2235_p1  ;;  %p2242_p7 = por %p2241_p0, %p2240_p13 }
  0x95   : > { %p2243_p5 = pnand %p2242_p7, %p2236_p12 }
  0x97   : > { %2246 = shalt.err (!%p2243_p5)
}
  0x98   : > { %s2247_s18 = scalar_lea.vmem %s2653_s17, 64  ;;  %s2360_s11 = smov [#allocation2]  }
  0x99   : > { %p2248_p8 = scmp.ne.s32.totalorder %s2653_s17, %s2247_s18  ;;  %s2252_s20 = sshll.u32 %s2360_s11, 4  ;;  %s2253_s20 = int_to_ptr.vmem [resolvable:$false] %s2252_s20 }
  0x9a   : > { %s2254_s27 = scalar_lea.vmem %s2253_s20, 128  ;;  %p2255_p4 = scmp.lt.s32.totalorder %s2653_s17, %s2253_s20 }
  0x9b   : > { %p2250_p1 = pnand %p2248_p8, %p2234_p11  ;;  %p2256_p3 = scmp.lt.s32.totalorder %s2254_s27, %s2247_s18 }
  0x9d   : > { %p2251_p9 = pneg %p2250_p1  ;;  %p2257_p6 = por %p2256_p3, %p2255_p4 }
  0x9f   : > { %p2258_p13 = pnand %p2257_p6, %p2251_p9 }
  0xa1   : > { %2261 = shalt.err (!%p2258_p13)
}
  0xa2   : > { %2012 = dma.hbm_to_vmem [thread:$0]  (!%p2649_p10), %s2645_s0, 64, %s2653_s17, %s527_s12  }
  0xa3   : > { %p2975_p12 = scmp.ne.s32.totalorder %s2963_s29, 0 }
  0xa4   : > { %s2683_s6 = sand.u32 (!%p2975_p12), 1, %s2336_s22  }
  0xa5   : > { %546 = sbr.rel (%p2975_p12) target bundleno = 3849 (0xf09), region = 84  ;;  %s1784_s5 = sshll.u32 (!%p2975_p12), %s2683_s6, 2 }
  0xa6   : > { %s549_s13 = scalar_lea.sflag (!%p2975_p12), [#allocation3], %s2683_s6  ;;  %s552_s19 = scalar_lea.vmem (!%p2975_p12), [#allocation2], %s1784_s5 }
  0xac   : > { %2315 = dma.done.wait (%p2624_p2), %s549_s13, 64  }
  0xad   : > { %2317 = vsyncadd (%p2624_p2), %s549_s13, 4294967232  ;;  %p2976_p4 = scmp.ne.s32.totalorder %s2962_s28, 0 }
  0xaf   : > { %2319 = dma.done.wait (%p2976_p4), [#allocation6], 272  }
  0xb0   : > { %2321 = vsyncadd (%p2976_p4), [#allocation6], 4294967024 }
  0xb1   : > { %2323 = dma.done.wait (%p2976_p4), [#allocation9], 32  }
  0xb2   : > { %2325 = vsyncadd (%p2976_p4), [#allocation9], 4294967264  ;;  %p624_p9 = scmp.lt.s32.totalorder %s2344_s24, 1  ;;  %v2361_v0 = vmov 0.0   ;;  %vm2362_vm0 = vmmov 0   ;;  %v2090_v1 = vld [vmem:[%s2928_s4] sm:$0xff]  }
  0xb3   : > { %1876 = vmatprep.subr.bf16.mxu1 %v2361_v0  ;;  %1868 = vmatprep.subr.bf16.mxu0 %v2361_v0  ;;  %v2091_v2 = vld [vmem:[%s2928_s4 + $0x8] sm:$0xff]   ;;  %s2977_s11 = sld [smem:[#allocation16_spill]]  ;;  %s2978_s2 = sld [smem:[#allocation18_spill]]  ;;  %v634_v4 = vld [vmem:[%s552_s19] sm:$0xf]  ;;  %vm658_vm1 = vcmask 261120  }
  0xb4   : > { %1880 = vmatprep.mubr.msk.bf16.mxu1 %vm2362_vm0, %v2361_v0  ;;  %1872 = vmatprep.mubr.msk.bf16.mxu0 %vm2362_vm0, %v2361_v0  ;;  %s625_s29 = scalar_select %p624_p9, %s2344_s24, 1  ;;  %vm770_vm2 = vcmask 64512   ;;  %vm835_vm3 = vcmask 1043456   ;;  %v993_v52 = vld [vmem:[#allocation5 + $0x4] sm:$0xf]  ;;  %vm1551_vm4 = vcmask 523264  }
  0xb5   : > { %1877 = vmatpush3.bf16.msra.mxu1 %v2090_v1  ;;  %s2979_s0 = sld [smem:[#allocation20_spill]]  ;;  %s2980_s10 = sld [smem:[#allocation19_spill]]  ;;  %v998_v53 = vsel %vm835_vm3, %v993_v52, 0  ;;  %v880_v58 = vld [vmem:[#allocation5] sm:$0xf] }
  0xb6   : > { %s1790_s14 = sshll.u32 %s625_s29, 3  ;;  %1878 = vmatprep.subr.bf16.mxu1 %v2361_v0  ;;  %s2363_s12 = smov 120   ;;  %v1044_v61 = vsel %vm835_vm3, %v880_v58, 0 }
  0xb7   : > { %s2364_s18 = smov 96   ;;  %s2367_s27 = smov 80  }
  0xb8   : > { %s2368_s5 = smov 104   ;;  %s2369_s13 = smov 72  }
  0xb9   : > { %s630_s20 = scalar_lea.vmem %s2977_s11, %s1790_s14  ;;  %v2092_v3 = vld [vmem:[%s2978_s2] sm:$0xff]   ;;  %v2093_v5 = vld [vmem:[%s2978_s2 + $0x8] sm:$0xff]   ;;  %1879 = vmatpush3.bf16.msra.mxu1 %v2091_v2  ;;  %s2365_s11 = smov 88  }
  0xba   : > { %1869 = vmatpush3.bf16.msra.mxu0 %v2092_v3  ;;  %v2723_v6 = vld [vmem:[%s630_s20] sm:$0xff]  ;;  %1890 = vmatprep.subr.bf16.mxu1 %v2361_v0  ;;  %s2366_s20 = smov 112   ;;  %s2981_s14 = sld [smem:[#allocation22_spill]] }
  0xbb   : > { %1870 = vmatprep.subr.bf16.mxu0 %v2361_v0  ;;  %v633_v7 = vpack.c.bf16 %v2723_v6, %v2723_v6  ;;  %v1795_v8 = vld [vmem:[%s2979_s0] ss:$0 sm:$0xff]  ;;  %s2983_s0 = sld [smem:[#allocation23_spill]]  ;;  %s2986_s29 = sld [smem:[#allocation27_spill]] }
  0xbc   : > { %1881 = vmatmul.mubr.msk.bf16.vlgmr.msra.gmra.mrb[0].mxu1 %vm658_vm1, %v634_v4  ;;  %v1791_v10 = vld [vmem:[%s2980_s10] ss:$0 sm:$0xff]  ;;  %s2984_s10 = sld [smem:[#allocation25_spill]]  ;;  %s1827_s19 = sshll.u32 %s2344_s24, 7 }
  0xbd   : > { %1892 = vmatprep.mubr.msk.bf16.mxu1 %vm2362_vm0, %v2361_v0  ;;  %s2987_s1 = sld [smem:[#allocation28_spill]]  ;;  %p2988_p10 = scmp.ne.s32.totalorder %s2971_s15, 0 }
  0xbe   : > { %1871 = vmatpush3.bf16.msra.mxu0 %v2093_v5  ;;  %s2370_s24 = smov [#allocation11]  }
  0xbf   : > { %1884 = vmatprep.subr.bf16.mxu0 %v2361_v0 }
  0xc1   : > { %1873 = vmatmul.mubr.msk.bf16.vlgmr.msra.gmra.mrb[0].mxu0 %vm658_vm1, %v633_v7 }
  0xc2   : > { %1886 = vmatprep.mubr.msk.bf16.mxu0 %vm2362_vm0, %v2361_v0 }
  0xc3   : > { %s2874_s2 = scalar_lea.hbm %s2987_s1, %s1827_s19 }
 0x18f   : > { %v763_v9 = vpop.f32.mrb[0].mxu1 }
 0x190   : > { %v764_v11 = vadd.f32 %v1795_v8, %v763_v9  ;;  %v1882_v12 = vpop.f32.mrb[1].mxu1 }
 0x191   : > { %v766_v13 = vpop.f32.mrb[2].mxu1 }
 0x192   : > { %v2742_v15 = vpack.c.bf16 %v764_v11, %v764_v11  ;;  %v1883_v16 = vpop.f32.mrb[3].mxu1 }
 0x194   : > { %v696_v14 = vpop.f32.mrb[0].mxu0  ;;  %884 = vrot.lane.b32.xlu0 %v2742_v15, %s2363_s12  ;;  %v775_v21 = vsel %vm770_vm2, %v2742_v15, 0 }
 0x195   : > { %v697_v17 = vadd.f32 %v1791_v10, %v696_v14  ;;  %v1874_v18 = vpop.f32.mrb[1].mxu0  ;;  %1885 = vmatpush3.bf16.xpose.msra.mxu0 %v775_v21 }
 0x196   : > { %v699_v19 = vpop.f32.mrb[2].mxu0  ;;  %1896 = vmatprep.subr.bf16.mxu0 %v2361_v0 }
 0x197   : > { %v2745_v20 = vpack.c.bf16 %v697_v17, %v697_v17  ;;  %v1875_v22 = vpop.f32.mrb[3].mxu0 }
 0x199   : > { %882 = vrot.lane.b32.xlu0 %v2745_v20, %s2363_s12  ;;  %s2982_s12 = sld [smem:[#allocation24_spill]] }
 0x19c   : > { %1887 = vmatmul.mubr.msk.bf16.vlgmr.msra.gmra.mrb[4].mxu0 %vm770_vm2, %v2745_v20 }
 0x19d   : > { %1898 = vmatprep.mubr.msk.bf16.mxu0 %vm2362_vm0, %v2361_v0 }
 0x206   : > { %v885_v23 = vpop.permute.xlu0 %884 }
 0x207   : > { %v890_v24 = vsel %vm770_vm2, %v885_v23, 0 }
 0x208   : > { %1897 = vmatpush3.bf16.xpose.msra.mxu0 %v890_v24 }
 0x209   : > { %1908 = vmatprep.subr.bf16.mxu0 %v2361_v0 }
 0x20b   : > { %v883_v25 = vpop.permute.xlu0 %882 }
 0x20f   : > { %1899 = vmatmul.mubr.msk.bf16.vlgmr.msra.gmra.mrb[8].mxu0 %vm770_vm2, %v883_v25 }
 0x210   : > { %1910 = vmatprep.mubr.msk.bf16.mxu0 %vm2362_vm0, %v2361_v0  ;;  %1909 = vmatpush3.bf16.msra.mxu0 %v998_v53 }
 0x211   : > { %1920 = vmatprep.subr.bf16.mxu0 %v2361_v0 }
 0x26f   : > { %v811_v26 = vpop.f32.mrb[4].mxu0 }
 0x270   : > { %v1888_v27 = vpop.f32.mrb[5].mxu0  ;;  %v817_v28 = vsel %vm770_vm2, %v811_v26, -inf }
 0x271   : > { %818 = vmax.xlane.f32.xlu1 %v817_v28  ;;  %v814_v29 = vpop.f32.mrb[6].mxu0 }
 0x272   : > { %v1889_v30 = vpop.f32.mrb[7].mxu0 }
 0x2e2   : > { %v926_v31 = vpop.f32.mrb[8].mxu0 }
 0x2e3   : > { %v1900_v32 = vpop.f32.mrb[9].mxu0  ;;  %v932_v33 = vsel %vm770_vm2, %v926_v31, -inf }
 0x2e4   : > { %933 = vmax.xlane.f32.xlu1 %v932_v33  ;;  %v929_v34 = vpop.f32.mrb[10].mxu0 }
 0x2e5   : > { %v1901_v35 = vpop.f32.mrb[11].mxu0 }
 0x2f5   : > { %830 = vrot.lane.b32.xlu1 %v2742_v15, %s2364_s18  ;;  %s1789_s18 = sshll.u32 %s2683_s6, 3 }
 0x2fe   : > { %v819_v36 = vpop.xlane.xlu1 %818 }
 0x2ff   : > { %v820_v37 = vsub.f32 %v811_v26, %v819_v36 }
 0x301   : > { %v821_v38 = vmul.f32 1.442695, %v820_v37 }
 0x303   : > { %2100 = vpow2.f32 %v821_v38 }
 0x30d   : > { %v2101_v39 = vpop.eup %2100 }
 0x30e   : > { %v823_v40 = vsel %vm770_vm2, %v2101_v39, 0.0 }
 0x30f   : > { %824 = vadd.xlane.f32.xlu0 %v823_v40 }
 0x371   : > { %v934_v41 = vpop.xlane.xlu1 %933 }
 0x372   : > { %v935_v42 = vsub.f32 %v926_v31, %v934_v41 }
 0x374   : > { %v936_v43 = vmul.f32 1.442695, %v935_v42  ;;  %v1197_v42 = vld [vmem:[#allocation5 + $0x8] sm:$0xf] }
 0x375   : > { %v831_v44 = vpop.permute.xlu1 %830 }
 0x376   : > { %2102 = vpow2.f32 %v936_v43  ;;  %v837_v45 = vsel %vm835_vm3, %v831_v44, 0  ;;  %v1202_v43 = vsel %vm835_vm3, %v1197_v42, 0  ;;  %v2098_v42 = vld [vmem:[%s2982_s12 + $0x10] sm:$0xff]  }
 0x377   : > { %1891 = vmatpush3.bf16.msra.mxu1 %v837_v45 }
 0x378   : > { %1902 = vmatprep.subr.bf16.mxu1 %v2361_v0 }
 0x380   : > { %v2103_v46 = vpop.eup %2102 }
 0x381   : > { %v938_v47 = vsel %vm770_vm2, %v2103_v46, 0.0 }
 0x382   : > { %939 = vadd.xlane.f32.xlu1 %v938_v47 }
 0x393   : > { %944 = vrot.lane.b32.xlu1 %v2742_v15, %s2365_s11  ;;  %s1627_s11 = scalar_lea.sflag [#allocation4], %s2683_s6 }
 0x397   : > { %1088 = vrot.lane.b32.xlu1 %v2742_v15, %s2366_s20 }
 0x39b   : > { %1086 = vrot.lane.b32.xlu1 %v2745_v20, %s2366_s20 }
 0x39c   : > { %v825_v48 = vpop.xlane.xlu0 %824 }
 0x39d   : > { %2104 = vrcp.f32 %v825_v48 }
 0x3a7   : > { %v2105_v49 = vpop.eup %2104 }
 0x3a8   : > { %v827_v50 = vmul.f32 %v2105_v49, %v2101_v39 }
 0x3aa   : > { %v828_v51 = vpack.c.bf16 %v827_v50, %v827_v50 }
 0x3ac   : > { %1893 = vmatmul.mubr.msk.bf16.vlgmr.msra.gmra.mrb[4].mxu1 %vm770_vm2, %v828_v51 }
 0x3ad   : > { %1904 = vmatprep.mubr.msk.bf16.mxu1 %vm2362_vm0, %v2361_v0 }
 0x40f   : > { %v940_v54 = vpop.xlane.xlu1 %939 }
 0x410   : > { %2106 = vrcp.f32 %v940_v54 }
 0x413   : > { %v945_v55 = vpop.permute.xlu1 %944 }
 0x414   : > { %v950_v56 = vsel %vm835_vm3, %v945_v55, 0 }
 0x415   : > { %1903 = vmatpush3.bf16.msra.mxu1 %v950_v56 }
 0x416   : > { %1914 = vmatprep.subr.bf16.mxu1 %v2361_v0 }
 0x417   : > { %v1089_v4 = vpop.permute.xlu1 %1088 }
 0x418   : > { %v1094_v10 = vsel %vm770_vm2, %v1089_v4, 0 }
 0x41a   : > { %v2107_v57 = vpop.eup %2106 }
 0x41b   : > { %v942_v59 = vmul.f32 %v2107_v57, %v2103_v46  ;;  %v1087_v12 = vpop.permute.xlu1 %1086 }
 0x41d   : > { %v943_v60 = vpack.c.bf16 %v942_v59, %v942_v59  ;;  %v1356_v59 = vld [vmem:[#allocation5 + $0xc] sm:$0xf] }
 0x41f   : > { %1905 = vmatmul.mubr.msk.bf16.vlgmr.msra.gmra.mrb[8].mxu1 %vm770_vm2, %v943_v60  ;;  %v1361_v60 = vsel %vm835_vm3, %v1356_v59, 0 }
 0x420   : > { %1915 = vmatpush3.bf16.msra.mxu1 %v1044_v61  ;;  %1916 = vmatprep.mubr.msk.bf16.mxu1 %vm2362_vm0, %v2361_v0 }
 0x421   : > { %1926 = vmatprep.subr.bf16.mxu1 %v2361_v0 }
 0x47f   : > { %v873_v62 = vpop.f32.mrb[4].mxu1 }
 0x480   : > { %v879_v63 = vpack.c.bf16 %v873_v62, %v873_v62  ;;  %v1894_v1 = vpop.f32.mrb[5].mxu1 }
 0x481   : > { %v876_v2 = vpop.f32.mrb[6].mxu1 }
 0x482   : > { %v1895_v3 = vpop.f32.mrb[7].mxu1  ;;  %1917 = vmatmul.mubr.msk.bf16.vlgmr.msra.gmra.mrb[12].mxu1 %vm770_vm2, %v879_v63 }
 0x483   : > { %1928 = vmatprep.mubr.msk.bf16.mxu1 %vm2362_vm0, %v2361_v0 }
 0x4f2   : > { %v986_v5 = vpop.f32.mrb[8].mxu1 }
 0x4f3   : > { %v992_v7 = vpack.c.bf16 %v986_v5, %v986_v5  ;;  %v1906_v8 = vpop.f32.mrb[9].mxu1 }
 0x4f4   : > { %v989_v9 = vpop.f32.mrb[10].mxu1 }
 0x4f5   : > { %v1907_v11 = vpop.f32.mrb[11].mxu1  ;;  %1911 = vmatmul.mubr.msk.bf16.vlgmr.msra.gmra.mrb[12].mxu0 %vm770_vm2, %v992_v7 }
 0x4f6   : > { %1921 = vmatpush3.bf16.xpose.msra.mxu0 %v1094_v10  ;;  %1922 = vmatprep.mubr.msk.bf16.mxu0 %vm2362_vm0, %v2361_v0 }
 0x4f7   : > { %1932 = vmatprep.subr.bf16.mxu0 %v2361_v0 }
 0x4fd   : > { %1923 = vmatmul.mubr.msk.bf16.vlgmr.msra.gmra.mrb[16].mxu0 %vm770_vm2, %v1087_v12 }
 0x4fe   : > { %1934 = vmatprep.mubr.msk.bf16.mxu0 %vm2362_vm0, %v2361_v0  ;;  %1933 = vmatpush3.bf16.msra.mxu0 %v1202_v43  ;;  %v2099_v43 = vld [vmem:[%s2982_s12 + $0x18] sm:$0xff]  }
 0x4ff   : > { %1944 = vmatprep.subr.bf16.mxu0 %v2361_v0 }
 0x555   : > { %v1080_v13 = vpop.f32.mrb[12].mxu1 }
 0x556   : > { %v1918_v14 = vpop.f32.mrb[13].mxu1 }
 0x557   : > { %v1083_v16 = vpop.f32.mrb[14].mxu1 }
 0x558   : > { %v1919_v17 = vpop.f32.mrb[15].mxu1  ;;  %v1811_v16 = vld [vmem:[#allocation7] ss:$0 sm:$0xff] }
 0x5c8   : > { %v1034_v18 = vpop.f32.mrb[12].mxu0 }
 0x5c9   : > { %v2793_v19 = vadd.f32 %v1080_v13, %v1034_v18  ;;  %v1912_v21 = vpop.f32.mrb[13].mxu0 }
 0x5ca   : > { %v1037_v22 = vpop.f32.mrb[14].mxu0 }
 0x5cb   : > { %v1913_v23 = vpop.f32.mrb[15].mxu0 }
 0x5d0   : > { %v1130_v24 = vpop.f32.mrb[16].mxu0 }
 0x5d1   : > { %v1924_v25 = vpop.f32.mrb[17].mxu0  ;;  %v1136_v26 = vsel %vm770_vm2, %v1130_v24, -inf }
 0x5d2   : > { %1137 = vmax.xlane.f32.xlu0 %v1136_v26  ;;  %v1133_v27 = vpop.f32.mrb[18].mxu0 }
 0x5d3   : > { %v1925_v28 = vpop.f32.mrb[19].mxu0 }
 0x5e8   : > { %1148 = vrot.lane.b32.xlu0 %v2742_v15, %s2367_s27  ;;  %s2985_s27 = sld [smem:[#allocation26_spill]] }
 0x5ec   : > { %1247 = vrot.lane.b32.xlu0 %v2742_v15, %s2368_s5 }
 0x5f0   : > { %1245 = vrot.lane.b32.xlu0 %v2745_v20, %s2368_s5 }
 0x65f   : > { %v1138_v29 = vpop.xlane.xlu0 %1137 }
 0x660   : > { %v1139_v30 = vsub.f32 %v1130_v24, %v1138_v29 }
 0x662   : > { %v1140_v31 = vmul.f32 1.442695, %v1139_v30  ;;  %v2094_v30 = vld [vmem:[%s2981_s14] sm:$0xff]  }
 0x663   : > { %v1149_v32 = vpop.permute.xlu0 %1148 }
 0x664   : > { %2108 = vpow2.f32 %v1140_v31  ;;  %v1154_v33 = vsel %vm835_vm3, %v1149_v32, 0  ;;  %v2095_v31 = vld [vmem:[%s2981_s14 + $0x8] sm:$0xff]  }
 0x665   : > { %1927 = vmatpush3.bf16.msra.mxu1 %v1154_v33  ;;  %v2097_v32 = vld [vmem:[%s2982_s12 + $0x8] sm:$0xff]  }
 0x666   : > { %1938 = vmatprep.subr.bf16.mxu1 %v2361_v0 }
 0x667   : > { %v1248_v39 = vpop.permute.xlu0 %1247 }
 0x668   : > { %v1253_v40 = vsel %vm770_vm2, %v1248_v39, 0  ;;  %v1813_v39 = vld [vmem:[#allocation10] ss:$0 sm:$0xff] }
 0x66b   : > { %v1246_v41 = vpop.permute.xlu0 %1245 }
 0x66e   : > { %v2109_v34 = vpop.eup %2108 }
 0x66f   : > { %v1142_v35 = vsel %vm770_vm2, %v2109_v34, 0.0 }
 0x670   : > { %1143 = vadd.xlane.f32.xlu1 %v1142_v35 }
 0x6fd   : > { %v1144_v36 = vpop.xlane.xlu1 %1143 }
 0x6fe   : > { %2110 = vrcp.f32 %v1144_v36 }
 0x708   : > { %v2111_v37 = vpop.eup %2110 }
 0x709   : > { %v1146_v38 = vmul.f32 %v2111_v37, %v2109_v34  ;;  %v1812_v37 = vld [vmem:[#allocation8] ss:$0 sm:$0xff] }
 0x70b   : > { %v1147_v20 = vpack.c.bf16 %v1146_v38, %v1146_v38 }
 0x70d   : > { %1929 = vmatmul.mubr.msk.bf16.vlgmr.msra.gmra.mrb[16].mxu1 %vm770_vm2, %v1147_v20 }
 0x70e   : > { %1939 = vmatpush3.bf16.xpose.msra.mxu1 %v1253_v40  ;;  %1940 = vmatprep.mubr.msk.bf16.mxu1 %vm2362_vm0, %v2361_v0 }
 0x70f   : > { %1950 = vmatprep.subr.bf16.mxu1 %v2361_v0 }
 0x715   : > { %1941 = vmatmul.mubr.msk.bf16.vlgmr.msra.gmra.mrb[20].mxu1 %vm770_vm2, %v1246_v41 }
 0x716   : > { %1952 = vmatprep.mubr.msk.bf16.mxu1 %vm2362_vm0, %v2361_v0  ;;  %1951 = vmatpush3.bf16.msra.mxu1 %v1361_v60 }
 0x717   : > { %1964 = vmatprep.subr.bf16.mxu1 %v2361_v0 }
 0x7e0   : > { %v1190_v44 = vpop.f32.mrb[16].mxu1 }
 0x7e1   : > { %v1196_v45 = vpack.c.bf16 %v1190_v44, %v1190_v44  ;;  %v1930_v46 = vpop.f32.mrb[17].mxu1  ;;  %v1814_v44 = vld [vmem:[%s2983_s0] ss:$0 sm:$0xff]  ;;  %s623_s0 = scalar_lea.vmem [#allocation11], %s1789_s18  ;;  %s2266_s18 = sshll.u32 %s2370_s24, 4  ;;  %s2267_s18 = int_to_ptr.vmem [resolvable:$false] %s2266_s18 }
 0x7e2   : > { %v1193_v47 = vpop.f32.mrb[18].mxu1  ;;  %s1641_s28 = sshll.u32 %s623_s0, 4  ;;  %s2876_s28 = int_to_ptr.vmem [resolvable:$true] %s1641_s28 }
 0x7e3   : > { %v1931_v48 = vpop.f32.mrb[19].mxu1  ;;  %1935 = vmatmul.mubr.msk.bf16.vlgmr.msra.gmra.mrb[20].mxu0 %vm770_vm2, %v1196_v45  ;;  %s2262_s20 = scalar_lea.vmem %s2876_s28, 128  ;;  %p2269_p7 = scmp.lt.s32.totalorder %s2876_s28, %s2267_s18 }
 0x7e4   : > { %1946 = vmatprep.mubr.msk.bf16.mxu0 %vm2362_vm0, %v2361_v0  ;;  %p2263_p2 = scmp.ne.s32.totalorder %s2876_s28, %s2262_s20 }
 0x7e6   : > { %p2264_p11 = pnand %p2263_p2, %p2988_p10 }
 0x7e8   : > { %v1289_v49 = vpop.f32.mrb[20].mxu1  ;;  %p2265_p0 = pneg %p2264_p11 }
 0x7e9   : > { %v1942_v50 = vpop.f32.mrb[21].mxu1  ;;  %v1295_v51 = vsel %vm770_vm2, %v1289_v49, -inf }
 0x7ea   : > { %1296 = vmax.xlane.f32.xlu0 %v1295_v51  ;;  %v1292_v52 = vpop.f32.mrb[22].mxu1 }
 0x7eb   : > { %v1943_v53 = vpop.f32.mrb[23].mxu1 }
 0x877   : > { %v1297_v54 = vpop.xlane.xlu0 %1296 }
 0x878   : > { %v1298_v55 = vsub.f32 %v1289_v49, %v1297_v54 }
 0x87a   : > { %v1299_v56 = vmul.f32 1.442695, %v1298_v55 }
 0x87c   : > { %2112 = vpow2.f32 %v1299_v56 }
 0x886   : > { %v2113_v57 = vpop.eup %2112 }
 0x887   : > { %v1301_v58 = vsel %vm770_vm2, %v2113_v57, 0.0 }
 0x888   : > { %1302 = vadd.xlane.f32.xlu1 %v1301_v58 }
 0x899   : > { %1307 = vrot.lane.b32.xlu1 %v2742_v15, %s2369_s13 }
 0x8b6   : > { %v1238_v61 = vpop.f32.mrb[20].mxu0 }
 0x8b7   : > { %v1244_v62 = vadd.f32 %v1238_v61, %v2793_v19  ;;  %v1936_v63 = vpop.f32.mrb[21].mxu0 }
 0x8b8   : > { %v1241_v1 = vpop.f32.mrb[22].mxu0 }
 0x8b9   : > { %v1937_v2 = vpop.f32.mrb[23].mxu0 }
 0x915   : > { %v1303_v3 = vpop.xlane.xlu1 %1302 }
 0x916   : > { %2114 = vrcp.f32 %v1303_v3 }
 0x919   : > { %v1308_v4 = vpop.permute.xlu1 %1307 }
 0x91a   : > { %v1313_v5 = vsel %vm835_vm3, %v1308_v4, 0 }
 0x91b   : > { %1945 = vmatpush3.bf16.msra.mxu0 %v1313_v5  ;;  %v1824_v5 = vld [vmem:[%s2985_s27] ss:$0 sm:$0xff]  ;;  %s2268_s27 = scalar_lea.vmem %s2267_s18, 256 }
 0x91c   : > { %1956 = vmatprep.subr.bf16.mxu0 %v2361_v0  ;;  %p2270_p5 = scmp.lt.s32.totalorder %s2268_s27, %s2262_s20 }
 0x91e   : > { %p2271_p8 = por %p2270_p5, %p2269_p7 }
 0x920   : > { %v2115_v15 = vpop.eup %2114  ;;  %p2272_p1 = pnand %p2271_p8, %p2265_p0 }
 0x921   : > { %v1305_v7 = vmul.f32 %v2115_v15, %v2113_v57 }
 0x923   : > { %v1306_v8 = vpack.c.bf16 %v1305_v7, %v1305_v7  ;;  %v1825_v7 = vld [vmem:[%s2986_s29] ss:$0 sm:$0xff] }
 0x925   : > { %1947 = vmatmul.mubr.msk.bf16.vlgmr.msra.gmra.mrb[24].mxu0 %vm770_vm2, %v1306_v8 }
 0x926   : > { %1960 = vmatprep.mubr.msk.bf16.mxu0 %vm2362_vm0, %v2361_v0  ;;  %1957 = vmatpush3.bf16.msra.mxu0 %v2094_v30 }
 0x927   : > { %1958 = vmatprep.subr.bf16.mxu0 %v2361_v0 }
 0x92a   : > { %1959 = vmatpush3.bf16.msra.mxu0 %v2095_v31 }
 0x9f8   : > { %v1349_v9 = vpop.f32.mrb[24].mxu0 }
 0x9f9   : > { %v1355_v10 = vpack.c.bf16 %v1349_v9, %v1349_v9  ;;  %v1948_v11 = vpop.f32.mrb[25].mxu0 }
 0x9fa   : > { %v1352_v12 = vpop.f32.mrb[26].mxu0 }
 0x9fb   : > { %v1949_v13 = vpop.f32.mrb[27].mxu0  ;;  %1953 = vmatmul.mubr.msk.bf16.vlgmr.msra.gmra.mrb[24].mxu1 %vm770_vm2, %v1355_v10 }
 0x9fc   : > { %1972 = vmatprep.mubr.msk.bf16.mxu1 %vm2362_vm0, %v2361_v0 }
 0xace   : > { %v1397_v14 = vpop.f32.mrb[24].mxu1 }
 0xacf   : > { %v1403_v17 = vadd.f32 %v1397_v14, %v1244_v62  ;;  %v1954_v18 = vpop.f32.mrb[25].mxu1 }
 0xad0   : > { %v1400_v19 = vpop.f32.mrb[26].mxu1 }
 0xad1   : > { %v1411_v21 = vadd.f32 %v1811_v16, %v1403_v17  ;;  %v1955_v22 = vpop.f32.mrb[27].mxu1 }
 0xad3   : > { %v1412_v23 = vadd.f32 %v1411_v21, %v2723_v6  ;;  %v2096_v6 = vld [vmem:[%s2982_s12] sm:$0xff]  }
 0xad4   : > { %1965 = vmatpush3.bf16.msra.mxu1 %v2096_v6 }
 0xad5   : > { %v1413_v24 = vsel %vm658_vm1, %v1412_v23, 0.0  ;;  %1966 = vmatprep.subr.bf16.mxu1 %v2361_v0 }
 0xad6   : > { %1414 = vadd.xlane.f32.xlu1 %v1413_v24 }
 0xad8   : > { %1967 = vmatpush3.bf16.msra.mxu1 %v2097_v32 }
 0xad9   : > { %1968 = vmatprep.subr.bf16.mxu1 %v2361_v0 }
 0xadc   : > { %1969 = vmatpush3.bf16.msra.mxu1 %v2098_v42 }
 0xadd   : > { %1970 = vmatprep.subr.bf16.mxu1 %v2361_v0  ;;  %v1818_v0 = vld [vmem:[%s2984_s10] ss:$0 sm:$0xff] }
 0xae0   : > { %1971 = vmatpush3.bf16.msra.mxu1 %v2099_v43 }
 0xb63   : > { %v1415_v25 = vpop.xlane.xlu1 %1414 }
 0xb64   : > { %v1417_v26 = vmul.f32 0.03125, %v1415_v25 }
 0xb66   : > { %v1418_v27 = vsub.f32 %v1412_v23, %v1417_v26 }
 0xb68   : > { %v1419_v28 = vmul.f32 %v1418_v27, %v1418_v27 }
 0xb6a   : > { %v1420_v29 = vsel %vm658_vm1, %v1419_v28, 0.0 }
 0xb6b   : > { %1421 = vadd.xlane.f32.xlu0 %v1420_v29 }
 0xbf8   : > { %v1422_v33 = vpop.xlane.xlu0 %1421 }
 0xbf9   : > { %v1423_v34 = vmul.f32 0.03125, %v1422_v33 }
 0xbfb   : > { %v1424_v35 = vadd.f32 1e-05, %v1423_v34 }
 0xbfd   : > { %2116 = vrsqrt.f32 %v1424_v35 }
 0xc07   : > { %v2117_v36 = vpop.eup %2116 }
 0xc08   : > { %v1426_v38 = vmul.f32 %v2117_v36, %v1418_v27 }
 0xc0a   : > { %v1434_v20 = vmul.f32 %v1812_v37, %v1426_v38 }
 0xc0c   : > { %v1442_v40 = vadd.f32 %v1813_v39, %v1434_v20 }
 0xc0e   : > { %v1443_v41 = vpack.c.bf16 %v1442_v40, %v1442_v40 }
 0xc10   : > { %1961 = vmatmul.mubr.msk.bf16.vlgmr.msra.gmra.mrb[28].mxu0 %vm658_vm1, %v1443_v41 }
 0xce3   : > { %v1504_v45 = vpop.f32.mrb[28].mxu0 }
 0xce4   : > { %v1505_v46 = vadd.f32 %v1814_v44, %v1504_v45  ;;  %v1962_v47 = vpop.f32.mrb[29].mxu0 }
 0xce5   : > { %v1507_v48 = vpop.f32.mrb[30].mxu0 }
 0xce6   : > { %v1510_v49 = vmax.f32 %v1505_v46, 0.0  ;;  %v1963_v50 = vpop.f32.mrb[31].mxu0 }
 0xce8   : > { %v1511_v51 = vpack.c.bf16 %v1510_v49, %v1510_v49 }
 0xcea   : > { %1973 = vmatmul.mubr.msk.bf16.vlgmr.msra.gmra.mrb[28].mxu1 %vm1551_vm4, %v1511_v51 }
 0xdbd   : > { %v1589_v52 = vpop.f32.mrb[28].mxu1 }
 0xdbe   : > { %v1590_v53 = vadd.f32 %v1818_v0, %v1589_v52  ;;  %v1974_v54 = vpop.f32.mrb[29].mxu1 }
 0xdbf   : > { %v1592_v55 = vpop.f32.mrb[30].mxu1 }
 0xdc0   : > { %v1975_v56 = vpop.f32.mrb[31].mxu1  ;;  %v1595_v57 = vadd.f32 %v1590_v53, %v1442_v40 }
 0xdc2   : > { %v1596_v58 = vsel %vm658_vm1, %v1595_v57, 0.0 }
 0xdc3   : > { %1597 = vadd.xlane.f32.xlu0 %v1596_v58 }
 0xe50   : > { %v1598_v59 = vpop.xlane.xlu0 %1597 }
 0xe51   : > { %v1599_v60 = vmul.f32 0.03125, %v1598_v59 }
 0xe53   : > { %v1600_v61 = vsub.f32 %v1595_v57, %v1599_v60 }
 0xe55   : > { %v1601_v62 = vmul.f32 %v1600_v61, %v1600_v61 }
 0xe57   : > { %v1602_v63 = vsel %vm658_vm1, %v1601_v62, 0.0 }
 0xe58   : > { %1603 = vadd.xlane.f32.xlu0 %v1602_v63 }
 0xee5   : > { %v1604_v1 = vpop.xlane.xlu0 %1603 }
 0xee6   : > { %v1605_v2 = vmul.f32 0.03125, %v1604_v1 }
 0xee8   : > { %v1606_v3 = vadd.f32 1e-05, %v1605_v2 }
 0xeea   : > { %2118 = vrsqrt.f32 %v1606_v3 }
 0xef4   : > { %v2119_v4 = vpop.eup %2118 }
 0xef5   : > { %v1608_v15 = vmul.f32 %v2119_v4, %v1600_v61 }
 0xef7   : > { %v1616_v8 = vmul.f32 %v1824_v5, %v1608_v15 }
 0xef9   : > { %v1624_v9 = vadd.f32 %v1825_v7, %v1616_v8 }
 0xefb   : > { %1625 = vst.msk [vmem:[%s623_s0] sm:$0xff] %vm658_vm1, %v1624_v9 }
 0xefc   : > { %2275 = shalt.err (!%p2272_p1)
}
 0xefd   : > { %s2276_s6 = scalar_lea.hbm %s2874_s2, 128  ;;  %s2280_s29 = scalar_lea.hbm %s2987_s1, 256 }
 0xefe   : > { %p2277_p3 = scmp.ne.s32.totalorder %s2874_s2, %s2276_s6  ;;  %p2281_p12 = scmp.lt.u32.totalorder %s2874_s2, %s2987_s1 }
 0xeff   : > { %p2282_p4 = scmp.lt.u32.totalorder %s2280_s29, %s2276_s6  ;;  %p2284_p2 = scmp.lt.u32.totalorder %s2276_s6, %s2874_s2 }
 0xf00   : > { %p2278_p6 = pnand %p2277_p3, %p2988_p10 }
 0xf01   : > { %p2283_p9 = por %p2282_p4, %p2281_p12 }
 0xf02   : > { %p2279_p13 = pneg %p2278_p6 }
 0xf03   : > { %p2285_p11 = por %p2284_p2, %p2283_p9 }
 0xf05   : > { %p2286_p0 = pnand %p2285_p11, %p2279_p13 }
 0xf07   : > { %2289 = shalt.err (!%p2286_p0)
}
 0xf08   : > { %1994 = dma.vmem_to_hbm [thread:$0]  (%p2988_p10), %s2876_s28, 128, %s2874_s2, %s1627_s11  }
 0xf09 PF: > { %s1653_s17 = sand.u32 1, %s2332_s21   ;;  %p2989_p7 = scmp.ne.s32.totalorder %s2972_s30, 0 }
 0xf0a   : > { %p2990_p5 = scmp.ge.s32.totalorder %s2352_s26, 2  ;;  %s1654_s10 = scalar_lea.sflag [#allocation4], %s1653_s17 }
 0xf0c   : > { %p2014_p8 = pnand %p2990_p5, %p2989_p7 }
 0xf0e   : > { %2327 = dma.done.wait (!%p2014_p8), %s1654_s10, 128  }
 0xf0f   : > { %2329 = vsyncadd (!%p2014_p8), %s1654_s10, 4294967168  ;;  %s34_s26 = sadd.s32 1, %s2352_s26   ;;  %s2991_s21 = smov %s2336_s22 }
 0xf10   : > { %p31_p1 = scmp.ge.s32.totalorder %s34_s26, 4   ;;  %s2992_s22 = smov %s2340_s23 }
 0xf11   : > { %s2993_s23 = smov %s2633_s16  ;;  %s2994_s24 = smov %s2348_s25 }
 0xf12   : > { %s2995_s25 = smov %s2997_s3  ;;  %33 = sbr.rel (!%p31_p1) target bundleno = 22 (0x16), region = 148 }
 0xf19   :  { %1659 = vsyncpa [#allocation3], 1 }
 0xf1a   :  { %1661 = vsyncpa [#allocation3 + $0x1], 1 }
 0xf1b   :  { %1662 = vsyncpa [#allocation6], 1 }
 0xf1c   :  { %1663 = vsyncpa [#allocation9], 1 }
 0xf1d   :  { %1664 = vsyncpa [#allocation4], 1 }
 0xf1e   :  { %1666 = vsyncpa [#allocation4 + $0x1], 1 }

</bundles_post_ra>
